<compile_context>
chip_gen: v7x
topology: tpu7x:2x2x1
jax: 0.10.0
libtpu: 0.0.40
codegen_flags: <defaults>
</compile_context>

<pallas_src>
from functools import partial

import jax
import jax.numpy as jnp
from jax.experimental import pallas as pl
from jax.experimental.pallas import tpu as pltpu


def _round_up(x, m):
    return (x + m - 1) // m * m


def _pcilt3x3_kernel(x_ref, w_ref, b_ref, o_ref, patch_ref, *,
                     K, OH, OW, OWp, Cin, amax, mm_dtype):
    # x_ref:     [1, H, W, Cin]      un-quantized f32 activations (one image)
    # w_ref:     [K*K*Cin, Cpad]     quantized weights (mm_dtype), Cout padded to 128
    # b_ref:     [1, Cpad]           f32 bias, zero-padded
    # o_ref:     [1, OH*OWp, Cpad]   f32 output, lane-dense (Cpad multiple of 128)
    # patch_ref: [OH, OWp, K*K*Cin]  f32 im2col scratch (OWp = OW rounded up to 8)
    x = x_ref[0]                                            # [H, W, Cin]
    # Activation quantization in f32 (keeps VPU work f32 on v5e).
    xq = jnp.clip(jnp.round(x * amax), 0.0, amax)

    # Zero the scratch once so the OW..OWp pad columns are well defined.
    patch_ref[...] = jnp.zeros_like(patch_ref)

    # im2col: one small store per 3x3 tap (all Cin channels at once).
    for kh in range(K):
        for kw in range(K):
            c0 = (kh * K + kw) * Cin
            patch_ref[:, :OW, c0:c0 + Cin] = xq[kh:kh + OH, kw:kw + OW, :]

    # One lane-dense MXU matmul: [OH*OWp, K*K*Cin] @ [K*K*Cin, Cpad] -> f32.
    patch = patch_ref[...].reshape(OH * OWp, K * K * Cin).astype(mm_dtype)
    acc = jnp.dot(patch, w_ref[...], preferred_element_type=jnp.float32)
    o_ref[0] = acc + b_ref[...]                              # broadcast bias


def winograd_pcilt_conv2d(x_nchw, weight, bias, *, activation_bits=8,
                          weight_bits=8):
    """Forward pass equivalent to WinogradPCILTConv2d (NCHW in / NCHW out):
    quantized 3x3, stride-1, valid convolution plus bias."""
    N, Cin, H, W = x_nchw.shape
    Cout = weight.shape[0]
    K = 3
    OH, OW = H - 2, W - 2
    OWp = _round_up(OW, 8)                    # sublane-friendly M padding
    Cpad = _round_up(max(Cout, 128), 128)     # lane-dense output / MXU N dim
    KKC = K * K * Cin

    amax = float(2 ** activation_bits - 1)
    wmax = float(2 ** weight_bits - 1)

    # bf16 keeps integer quantization levels (<=255) exact while halving
    # weight bytes and doubling MXU rate; fall back to f32 for wider quantizers.
    mm_dtype = jnp.bfloat16 if max(activation_bits, weight_bits) <= 8 else jnp.float32

    # Weight quantization (matches _quantize_weights: scale, round, clamp to [0, 2^b-1]).
    qw = jnp.clip(jnp.round(weight.astype(jnp.float32) * wmax), 0.0, wmax)
    # [Cout, Cin, K, K] -> [kh, kw, Cin, Cout] -> [K*K*Cin, Cout] -> pad lanes to Cpad.
    w_mat = jnp.transpose(qw, (2, 3, 1, 0)).reshape(KKC, Cout)
    w_mat = jnp.pad(w_mat, ((0, 0), (0, Cpad - Cout))).astype(mm_dtype)
    b_mat = jnp.pad(bias.astype(jnp.float32).reshape(1, Cout),
                    ((0, 0), (0, Cpad - Cout)))

    # NCHW -> NHWC once in the wrapper (channels-last kept; Cout padded instead).
    x_nhwc = jnp.transpose(x_nchw, (0, 2, 3, 1)).astype(jnp.float32)

    kernel = partial(_pcilt3x3_kernel, K=K, OH=OH, OW=OW, OWp=OWp, Cin=Cin,
                     amax=amax, mm_dtype=mm_dtype)

    # NOTE: for realistic H/W, add a second row-tile grid axis (halo = K-1 rows)
    # so blocks fit v7x's 64 MiB VMEM; at 16x16 one image per step is optimal.
    out_flat = pl.pallas_call(
        kernel,
        out_shape=jax.ShapeDtypeStruct((N, OH * OWp, Cpad), jnp.float32),
        grid=(N,),
        in_specs=[
            pl.BlockSpec((1, H, W, Cin), lambda n: (n, 0, 0, 0)),
            pl.BlockSpec((KKC, Cpad), lambda n: (0, 0)),
            pl.BlockSpec((1, Cpad), lambda n: (0, 0)),
        ],
        out_specs=pl.BlockSpec((1, OH * OWp, Cpad), lambda n: (n, 0, 0)),
        scratch_shapes=[pltpu.VMEM((OH, OWp, KKC), jnp.float32)],
        compiler_params=pltpu.CompilerParams(
            dimension_semantics=("parallel",),
            vmem_limit_bytes=48 * 1024 * 1024,   # safe on v5e/v6e/v7x
        ),
    )(x_nhwc, w_mat, b_mat)

    # [N, OH*OWp, Cpad] -> [N, Cout, OH, OW] (drop OW / Cout padding).
    out = out_flat.reshape(N, OH, OWp, Cpad)[:, :, :OW, :Cout]
    return jnp.transpose(out, (0, 3, 1, 2))


if __name__ == "__main__":
    # Small shapes consistent with the module's forward pass.
    N, Cin, H, W = 2, 4, 16, 16
    Cout = 8
    act_bits, w_bits = 8, 8

    key = jax.random.PRNGKey(0)
    kx, kw = jax.random.split(key)
    x = jax.random.uniform(kx, (N, Cin, H, W), dtype=jnp.float32)          # NCHW input
    weight = jax.random.normal(kw, (Cout, Cin, 3, 3), dtype=jnp.float32)   # like torch.randn
    bias = jnp.zeros((Cout,), dtype=jnp.float32)                           # like torch.zeros

    out = winograd_pcilt_conv2d(x, weight, bias, activation_bits=act_bits,
                                weight_bits=w_bits)
    out = jax.block_until_ready(out)

    # Reference: valid 3x3 conv of quantized activations with quantized weights (+ bias).
    amax = float(2 ** act_bits - 1)
    wmax = float(2 ** w_bits - 1)
    xq_ref = jnp.clip(jnp.round(x * amax), 0.0, amax)
    qw_ref = jnp.clip(jnp.round(weight * wmax), 0.0, wmax)
    ref = jax.lax.conv_general_dilated(
        xq_ref, qw_ref, window_strides=(1, 1), padding="VALID",
        dimension_numbers=("NCHW", "OIHW", "NCHW"),
    ) + bias[None, :, None, None]

    assert out.shape == (N, Cout, H - 2, W - 2), out.shape
    assert jnp.allclose(out, ref, rtol=1e-5, atol=1e-2), (
        float(jnp.max(jnp.abs(out - ref))))
    print("KERNEL_OK")
</pallas_src>

<mosaic_0001>
module attributes {stable_mosaic.version = 11 : i64} {
  func.func @_pcilt3x3_kernel(%arg0: i32, %arg1: memref<1x16x16x4xf32, #tpu.memory_space<vmem>>, %arg2: memref<36x128xbf16, #tpu.memory_space<vmem>>, %arg3: memref<1x128xf32, #tpu.memory_space<vmem>>, %arg4: memref<1x224x128xf32, #tpu.memory_space<vmem>>, %arg5: memref<14x16x36xf32, #tpu.memory_space<vmem>>) attributes {dimension_semantics = [#tpu.dimension_semantics<parallel>], iteration_bounds = array<i64: 2>, scalar_prefetch = 0 : i64, scratch_operands = 1 : i64, tpu.core_type = #tpu.core_type<tc>, window_params = [{transform_indices = @transform_0, window_bounds = array<i64: 1, 16, 16, 4>}, {pipeline_mode = #tpu.pipeline_mode<synchronous>, transform_indices = @transform_1, window_bounds = array<i64: 36, 128>}, {pipeline_mode = #tpu.pipeline_mode<synchronous>, transform_indices = @transform_2, window_bounds = array<i64: 1, 128>}, {transform_indices = @transform_3, window_bounds = array<i64: 1, 224, 128>}]} {
    %c0 = arith.constant 0 : index
    %c0_0 = arith.constant 0 : index
    %c0_1 = arith.constant 0 : index
    %c0_2 = arith.constant 0 : index
    %0 = vector.load %arg1[%c0, %c0_0, %c0_1, %c0_2] : memref<1x16x16x4xf32, #tpu.memory_space<vmem>>, vector<1x16x16x4xf32>
    %1 = vector.shape_cast %0 : vector<1x16x16x4xf32> to vector<16x16x4xf32>
    %cst = arith.constant 2.550000e+02 : f32
    %2 = vector.broadcast %cst : f32 to vector<16x16x4xf32>
    %3 = arith.mulf %1, %2 : vector<16x16x4xf32>
    %4 = math.roundeven %3 : vector<16x16x4xf32>
    %cst_3 = arith.constant 0.000000e+00 : f32
    %cst_4 = arith.constant 2.550000e+02 : f32
    %5 = vector.broadcast %cst_3 : f32 to vector<16x16x4xf32>
    %6 = arith.maximumf %5, %4 : vector<16x16x4xf32>
    %7 = vector.broadcast %cst_4 : f32 to vector<16x16x4xf32>
    %8 = arith.minimumf %7, %6 : vector<16x16x4xf32>
    %cst_5 = arith.constant 0.000000e+00 : f32
    %9 = vector.broadcast %cst_5 : f32 to vector<14x16x36xf32>
    %c0_6 = arith.constant 0 : index
    %c0_7 = arith.constant 0 : index
    %c0_8 = arith.constant 0 : index
    %10 = vector.load %arg5[%c0_6, %c0_7, %c0_8] : memref<14x16x36xf32, #tpu.memory_space<vmem>>, vector<14x16x36xf32>
    tpu.vector_store %arg5[%c0_6, %c0_7, %c0_8], %9 {strides = array<i32>} : memref<14x16x36xf32, #tpu.memory_space<vmem>>, vector<14x16x36xf32>,
    %11 = vector.extract_strided_slice %8 {offsets = [0, 0, 0], sizes = [14, 14, 4], strides = [1, 1, 1]} : vector<16x16x4xf32> to vector<14x14x4xf32>
    %c0_9 = arith.constant 0 : index
    %c0_10 = arith.constant 0 : index
    %c0_11 = arith.constant 0 : index
    %12 = vector.load %arg5[%c0_9, %c0_10, %c0_11] : memref<14x16x36xf32, #tpu.memory_space<vmem>>, vector<14x14x4xf32>
    tpu.vector_store %arg5[%c0_9, %c0_10, %c0_11], %11 {strides = array<i32>} : memref<14x16x36xf32, #tpu.memory_space<vmem>>, vector<14x14x4xf32>,
    %13 = vector.extract_strided_slice %8 {offsets = [0, 1, 0], sizes = [14, 14, 4], strides = [1, 1, 1]} : vector<16x16x4xf32> to vector<14x14x4xf32>
    %c0_12 = arith.constant 0 : index
    %c0_13 = arith.constant 0 : index
    %c4 = arith.constant 4 : index
    %14 = vector.load %arg5[%c0_12, %c0_13, %c4] : memref<14x16x36xf32, #tpu.memory_space<vmem>>, vector<14x14x4xf32>
    tpu.vector_store %arg5[%c0_12, %c0_13, %c4], %13 {strides = array<i32>} : memref<14x16x36xf32, #tpu.memory_space<vmem>>, vector<14x14x4xf32>,
    %15 = vector.extract_strided_slice %8 {offsets = [0, 2, 0], sizes = [14, 14, 4], strides = [1, 1, 1]} : vector<16x16x4xf32> to vector<14x14x4xf32>
    %c0_14 = arith.constant 0 : index
    %c0_15 = arith.constant 0 : index
    %c8 = arith.constant 8 : index
    %16 = vector.load %arg5[%c0_14, %c0_15, %c8] : memref<14x16x36xf32, #tpu.memory_space<vmem>>, vector<14x14x4xf32>
    tpu.vector_store %arg5[%c0_14, %c0_15, %c8], %15 {strides = array<i32>} : memref<14x16x36xf32, #tpu.memory_space<vmem>>, vector<14x14x4xf32>,
    %17 = vector.extract_strided_slice %8 {offsets = [1, 0, 0], sizes = [14, 14, 4], strides = [1, 1, 1]} : vector<16x16x4xf32> to vector<14x14x4xf32>
    %c0_16 = arith.constant 0 : index
    %c0_17 = arith.constant 0 : index
    %c12 = arith.constant 12 : index
    %18 = vector.load %arg5[%c0_16, %c0_17, %c12] : memref<14x16x36xf32, #tpu.memory_space<vmem>>, vector<14x14x4xf32>
    tpu.vector_store %arg5[%c0_16, %c0_17, %c12], %17 {strides = array<i32>} : memref<14x16x36xf32, #tpu.memory_space<vmem>>, vector<14x14x4xf32>,
    %19 = vector.extract_strided_slice %8 {offsets = [1, 1, 0], sizes = [14, 14, 4], strides = [1, 1, 1]} : vector<16x16x4xf32> to vector<14x14x4xf32>
    %c0_18 = arith.constant 0 : index
    %c0_19 = arith.constant 0 : index
    %c16 = arith.constant 16 : index
    %20 = vector.load %arg5[%c0_18, %c0_19, %c16] : memref<14x16x36xf32, #tpu.memory_space<vmem>>, vector<14x14x4xf32>
    tpu.vector_store %arg5[%c0_18, %c0_19, %c16], %19 {strides = array<i32>} : memref<14x16x36xf32, #tpu.memory_space<vmem>>, vector<14x14x4xf32>,
    %21 = vector.extract_strided_slice %8 {offsets = [1, 2, 0], sizes = [14, 14, 4], strides = [1, 1, 1]} : vector<16x16x4xf32> to vector<14x14x4xf32>
    %c0_20 = arith.constant 0 : index
    %c0_21 = arith.constant 0 : index
    %c20 = arith.constant 20 : index
    %22 = vector.load %arg5[%c0_20, %c0_21, %c20] : memref<14x16x36xf32, #tpu.memory_space<vmem>>, vector<14x14x4xf32>
    tpu.vector_store %arg5[%c0_20, %c0_21, %c20], %21 {strides = array<i32>} : memref<14x16x36xf32, #tpu.memory_space<vmem>>, vector<14x14x4xf32>,
    %23 = vector.extract_strided_slice %8 {offsets = [2, 0, 0], sizes = [14, 14, 4], strides = [1, 1, 1]} : vector<16x16x4xf32> to vector<14x14x4xf32>
    %c0_22 = arith.constant 0 : index
    %c0_23 = arith.constant 0 : index
    %c24 = arith.constant 24 : index
    %24 = vector.load %arg5[%c0_22, %c0_23, %c24] : memref<14x16x36xf32, #tpu.memory_space<vmem>>, vector<14x14x4xf32>
    tpu.vector_store %arg5[%c0_22, %c0_23, %c24], %23 {strides = array<i32>} : memref<14x16x36xf32, #tpu.memory_space<vmem>>, vector<14x14x4xf32>,
    %25 = vector.extract_strided_slice %8 {offsets = [2, 1, 0], sizes = [14, 14, 4], strides = [1, 1, 1]} : vector<16x16x4xf32> to vector<14x14x4xf32>
    %c0_24 = arith.constant 0 : index
    %c0_25 = arith.constant 0 : index
    %c28 = arith.constant 28 : index
    %26 = vector.load %arg5[%c0_24, %c0_25, %c28] : memref<14x16x36xf32, #tpu.memory_space<vmem>>, vector<14x14x4xf32>
    tpu.vector_store %arg5[%c0_24, %c0_25, %c28], %25 {strides = array<i32>} : memref<14x16x36xf32, #tpu.memory_space<vmem>>, vector<14x14x4xf32>,
    %27 = vector.extract_strided_slice %8 {offsets = [2, 2, 0], sizes = [14, 14, 4], strides = [1, 1, 1]} : vector<16x16x4xf32> to vector<14x14x4xf32>
    %c0_26 = arith.constant 0 : index
    %c0_27 = arith.constant 0 : index
    %c32 = arith.constant 32 : index
    %28 = vector.load %arg5[%c0_26, %c0_27, %c32] : memref<14x16x36xf32, #tpu.memory_space<vmem>>, vector<14x14x4xf32>
    tpu.vector_store %arg5[%c0_26, %c0_27, %c32], %27 {strides = array<i32>} : memref<14x16x36xf32, #tpu.memory_space<vmem>>, vector<14x14x4xf32>,
    %c0_28 = arith.constant 0 : index
    %c0_29 = arith.constant 0 : index
    %c0_30 = arith.constant 0 : index
    %29 = vector.load %arg5[%c0_28, %c0_29, %c0_30] : memref<14x16x36xf32, #tpu.memory_space<vmem>>, vector<14x16x36xf32>
    %30 = vector.shape_cast %29 : vector<14x16x36xf32> to vector<224x36xf32>
    %31 = arith.truncf %30 : vector<224x36xf32> to vector<224x36xbf16>
    %c0_31 = arith.constant 0 : index
    %c0_32 = arith.constant 0 : index
    %32 = vector.load %arg2[%c0_31, %c0_32] : memref<36x128xbf16, #tpu.memory_space<vmem>>, vector<36x128xbf16>
    %cst_33 = arith.constant dense<0.000000e+00> : vector<224x128xf32>
    %33 = tpu.matmul %31, %32, %cst_33 {dimension_numbers = #tpu.dot_dimension_numbers<[1], [0], [0], [1], [0, 0, 1, 1], [], []>} : vector<224x36xbf16>, vector<36x128xbf16>, vector<224x128xf32> -> vector<224x128xf32>
    %c0_34 = arith.constant 0 : index
    %c0_35 = arith.constant 0 : index
    %34 = vector.load %arg3[%c0_34, %c0_35] : memref<1x128xf32, #tpu.memory_space<vmem>>, vector<1x128xf32>
    %35 = vector.broadcast %34 : vector<1x128xf32> to vector<224x128xf32>
    %36 = arith.addf %33, %35 : vector<224x128xf32>
    %c0_36 = arith.constant 0 : index
    %c0_37 = arith.constant 0 : index
    %c0_38 = arith.constant 0 : index
    %37 = vector.load %arg4[%c0_36, %c0_37, %c0_38] : memref<1x224x128xf32, #tpu.memory_space<vmem>>, vector<1x224x128xf32>
    %38 = vector.shape_cast %37 : vector<1x224x128xf32> to vector<224x128xf32>
    %39 = vector.shape_cast %36 : vector<224x128xf32> to vector<1x224x128xf32>
    tpu.vector_store %arg4[%c0_36, %c0_37, %c0_38], %39 {strides = array<i32>} : memref<1x224x128xf32, #tpu.memory_space<vmem>>, vector<1x224x128xf32>,
    return
  }
  func.func @transform_0(%arg0: i32) -> (i32, i32, i32, i32) {
    %c0_i32 = arith.constant 0 : i32
    %c0_i32_0 = arith.constant 0 : i32
    %c0_i32_1 = arith.constant 0 : i32
    %c0_i32_2 = arith.constant 0 : i32
    return %arg0, %c0_i32, %c0_i32_0, %c0_i32_1 : i32, i32, i32, i32
  }
  func.func @transform_1(%arg0: i32) -> (i32, i32) {
    %c0_i32 = arith.constant 0 : i32
    %c0_i32_0 = arith.constant 0 : i32
    %c0_i32_1 = arith.constant 0 : i32
    return %c0_i32, %c0_i32_0 : i32, i32
  }
  func.func @transform_2(%arg0: i32) -> (i32, i32) {
    %c0_i32 = arith.constant 0 : i32
    %c0_i32_0 = arith.constant 0 : i32
    %c0_i32_1 = arith.constant 0 : i32
    return %c0_i32, %c0_i32_0 : i32, i32
  }
  func.func @transform_3(%arg0: i32) -> (i32, i32, i32) {
    %c0_i32 = arith.constant 0 : i32
    %c0_i32_0 = arith.constant 0 : i32
    %c0_i32_1 = arith.constant 0 : i32
    return %arg0, %c0_i32, %c0_i32_0 : i32, i32, i32
  }
}

</mosaic_0001>

<bundles_post_ra>
// kernel: tpu_custom_call.1
= control target key start
LH: loop header
LB: loop body
LE: loop exit
PB: predicated region body
PF: predicated region fallthrough
CT: control target
= control target key end

     0   :  { %8 = vsyncpa [#allocation4], 0  ;;  %s3006_s0 = inlined_call_operand.vmem [shape: f32[2,16,16,4], index: 0, kind: input, shape index: {}]   ;;  %s3007_s1 = inlined_call_operand.vmem [shape: bf16[36,128], index: 1, kind: input, shape index: {}]   ;;  %s3008_s2 = inlined_call_operand.vmem [shape: f32[1,128], index: 2, kind: input, shape index: {}]   ;;  %s3009_s3 = inlined_call_operand.hbm [shape: f32[2,224,128], index: 3, kind: output, shape index: {}]  }
   0x1   :  { %10 = vsyncpa [#allocation4 + $0x1], 0  ;;  %s1965_s12 = smov 0   ;;  %s1967_s13 = smov 0  }
   0x2   :  { %s1969_s14 = smov 0   ;;  %s1971_s15 = smov 0  }
   0x3 LB: > { %s1986_s16 = sadd.s32 4294967295, %s1932_s15   ;;  %s1697_s17 = sadd.s32 4294967294, %s1932_s15   ;;  %s1932_s15 = sphi %s1971_s15, %s3015_s15   ;;  %s1928_s14 = sphi %s1969_s14, %s3014_s14   ;;  %s1924_s13 = sphi %s1967_s13, %s3013_s13   ;;  %s1920_s12 = sphi %s1965_s12, %s3012_s12  }
   0x4   : > { %s1990_s18 = sadd.s32 1, %s1932_s15   ;;  %s91_s19 = sadd.s32 1, %s1928_s14 }
   0x5   : > { %s88_s20 = ssub.s32 %s1932_s15, %s1990_s18  ;;  %p101_p0 = scmp.ne.s32.totalorder %s1928_s14, %s1924_s13 }
   0x6   : > { %p89_p1 = scmp.eq.s32.totalorder %s88_s20, 0  ;;  %p102_p2 = scmp.eq.s32.totalorder %s1986_s16, 1 }
   0x7   : > { %p107_p3 = scmp.ne.s32.totalorder %s1924_s13, %s1920_s12  ;;  %p108_p4 = scmp.eq.s32.totalorder %s1697_s17, 1 }
   0x8   : > { %s2001_s21 = scalar_select %p89_p1, %s1928_s14, %s91_s19  }
   0x9   : > { %p2003_p5 = por %p102_p2, %p101_p0  ;;  %p2007_p6 = por %p108_p4, %p107_p3 }
   0xa   : > { %p1700_p7 = scmp.ge.s32.totalorder %s1932_s15, 1  ;;  %p140_p8 = scmp.lt.s32.totalorder %s1932_s15, 3 }
   0xc   : > { %p141_p9 = pnand %p1700_p7, %p140_p8 }
   0xd   : > { %p164_p10 = scmp.lt.s32.totalorder (!%p141_p9), %s1986_s16, 1  ;;  %vm330_vm0 = vcmask (!%p141_p9), 293888   ;;  %v1934_v0 = vmov (!%p141_p9), 0.0   ;;  %vm359_vm1 = vcmask (!%p141_p9), 31744   ;;  %vm361_vm2 = vcmask (!%p141_p9), 29696   ;;  %s1935_s29 = smov (!%p141_p9), 4  }
   0xe   : > { %144 = sbr.rel (%p141_p9) target bundleno = 836 (0x344), region = 32  ;;  %333 = vst.msk [vmem:[#allocation2 + $0x10] sm:$0xff] (!%p141_p9), %vm330_vm0, %v1934_v0  ;;  %331 = vst.msk [vmem:[#allocation2] sm:$0xff] (!%p141_p9), %vm330_vm0, %v1934_v0  ;;  %s1936_s30 = smov (!%p141_p9), 8   ;;  %vm501_vm3 = vcmask (!%p141_p9), 64545   ;;  %vm503_vm4 = vcmask (!%p141_p9), 63520  }
   0xf   : > { %332 = vst.msk [vmem:[#allocation2 + $0x8] sm:$0xff] (!%p141_p9), %vm330_vm0, %v1934_v0  ;;  %334 = vst.msk [vmem:[#allocation2 + $0x18] sm:$0xff] (!%p141_p9), %vm330_vm0, %v1934_v0  ;;  %s1937_s4 = smov (!%p141_p9), 12   ;;  %s1938_s5 = smov (!%p141_p9), 16   ;;  %vm1444_vm5 = vcmask (!%p141_p9), 1041408   ;;  %vm617_vm6 = vcmask (!%p141_p9), 97344  }
  0x10   : > { %335 = vst.msk [vmem:[#allocation2 + $0x20] sm:$0xff] (!%p141_p9), %vm330_vm0, %v1934_v0  ;;  %336 = vst.msk [vmem:[#allocation2 + $0x28] sm:$0xff] (!%p141_p9), %vm330_vm0, %v1934_v0  ;;  %s1939_s6 = smov (!%p141_p9), 20   ;;  %s1940_s7 = smov (!%p141_p9), 24   ;;  %vm615_vm7 = vcmask (!%p141_p9), 97346   ;;  %vm733_vm8 = vcmask (!%p141_p9), 128096  }
  0x11   : > { %337 = vst.msk [vmem:[#allocation2 + $0x30] sm:$0xff] (!%p141_p9), %vm330_vm0, %v1934_v0  ;;  %338 = vst.msk [vmem:[#allocation2 + $0x38] sm:$0xff] (!%p141_p9), %vm330_vm0, %v1934_v0  ;;  %s1941_s10 = smov (!%p141_p9), 28   ;;  %vm731_vm9 = vcmask (!%p141_p9), 130144   ;;  %vm845_vm10 = vcmask (!%p141_p9), 162945   ;;  %vm847_vm11 = vcmask (!%p141_p9), 161920  }
  0x12   : > { %339 = vst.msk [vmem:[#allocation2 + $0x40] sm:$0xff] (!%p141_p9), %vm330_vm0, %v1934_v0  ;;  %340 = vst.msk [vmem:[#allocation2 + $0x48] sm:$0xff] (!%p141_p9), %vm330_vm0, %v1934_v0  ;;  %vm959_vm12 = vcmask (!%p141_p9), 195746   ;;  %vm961_vm13 = vcmask (!%p141_p9), 195744   ;;  %vm1075_vm14 = vcmask (!%p141_p9), 228544   ;;  %vm1077_vm15 = vcmask (!%p141_p9), 226496  }
  0x13   : > { %341 = vst.msk [vmem:[#allocation2 + $0x50] sm:$0xff] (!%p141_p9), %vm330_vm0, %v1934_v0  ;;  %342 = vst.msk [vmem:[#allocation2 + $0x58] sm:$0xff] (!%p141_p9), %vm330_vm0, %v1934_v0 }
  0x14   : > { %343 = vst.msk [vmem:[#allocation2 + $0x60] sm:$0xff] (!%p141_p9), %vm330_vm0, %v1934_v0  ;;  %344 = vst.msk [vmem:[#allocation2 + $0x68] sm:$0xff] (!%p141_p9), %vm330_vm0, %v1934_v0 }
  0x15   : > { %345 = vst.msk [vmem:[#allocation2 + $0x70] sm:$0xff] %vm330_vm0, %v1934_v0  ;;  %346 = vst.msk [vmem:[#allocation2 + $0x78] sm:$0xff] %vm330_vm0, %v1934_v0  ;;  %s165_s24 = scalar_select %p164_p10, %s1986_s16, 1 }
  0x16   : > { %347 = vst.msk [vmem:[#allocation2 + $0x80] sm:$0xff] %vm330_vm0, %v1934_v0  ;;  %348 = vst.msk [vmem:[#allocation2 + $0x88] sm:$0xff] %vm330_vm0, %v1934_v0 }
  0x17   : > { %349 = vst.msk [vmem:[#allocation2 + $0x90] sm:$0xff] %vm330_vm0, %v1934_v0  ;;  %350 = vst.msk [vmem:[#allocation2 + $0x98] sm:$0xff] %vm330_vm0, %v1934_v0  ;;  %s1724_s25 = sshll.u32 %s165_s24, 8  ;;  %s1942_s24 = smov 32  }
  0x18   : > { %351 = vst.msk [vmem:[#allocation2 + $0xa0] sm:$0xff] %vm330_vm0, %v1934_v0  ;;  %352 = vst.msk [vmem:[#allocation2 + $0xa8] sm:$0xff] %vm330_vm0, %v1934_v0  ;;  %s2048_s28 = scalar_lea.vmem %s3006_s0, %s1724_s25  ;;  %s161_s25 = sand.u32 1, %s1924_s13  }
  0x19   : > { %353 = vst.msk [vmem:[#allocation2 + $0xb0] sm:$0xff] %vm330_vm0, %v1934_v0  ;;  %354 = vst.msk [vmem:[#allocation2 + $0xb8] sm:$0xff] %vm330_vm0, %v1934_v0  ;;  %v172_v1 = vld [vmem:[%s2048_s28 + $0x10] sm:$0xff]  ;;  %v170_v2 = vld [vmem:[%s2048_s28] sm:$0xff]  ;;  %s1784_s26 = smul.u32 224, %s161_s25  ;;  %s2964_s8 = scalar_lea.sflag [#allocation4], %s161_s25 }
  0x1a   : > { %355 = vst.msk [vmem:[#allocation2 + $0xc0] sm:$0xff] %vm330_vm0, %v1934_v0  ;;  %356 = vst.msk [vmem:[#allocation2 + $0xc8] sm:$0xff] %vm330_vm0, %v1934_v0  ;;  %v173_v3 = vld [vmem:[%s2048_s28 + $0x18] sm:$0xff]  ;;  %v204_v4 = vmul.f32 255.0, %v172_v1  ;;  %v202_v5 = vmul.f32 255.0, %v170_v2  ;;  %v171_v7 = vld [vmem:[%s2048_s28 + $0x8] sm:$0xff] }
  0x1b   : > { %357 = vst.msk [vmem:[#allocation2 + $0xd0] sm:$0xff] %vm330_vm0, %v1934_v0  ;;  %358 = vst.msk [vmem:[#allocation2 + $0xd8] sm:$0xff] %vm330_vm0, %v1934_v0  ;;  %v205_v6 = vmul.f32 255.0, %v173_v3  ;;  %v175_v8 = vld [vmem:[%s2048_s28 + $0x28] sm:$0xff]  ;;  %v174_v9 = vld [vmem:[%s2048_s28 + $0x20] sm:$0xff]  ;;  %v203_v10 = vmul.f32 255.0, %v171_v7 }
  0x1c   : > { %v207_v11 = vmul.f32 255.0, %v175_v8  ;;  %v206_v12 = vmul.f32 255.0, %v174_v9  ;;  %v177_v13 = vld [vmem:[%s2048_s28 + $0x38] sm:$0xff]  ;;  %v176_v14 = vld [vmem:[%s2048_s28 + $0x30] sm:$0xff]  ;;  %v1787_v15 = vround.rtne.f32 %v204_v4  ;;  %v1785_v16 = vround.rtne.f32 %v202_v5  ;;  %v179_v27 = vld [vmem:[%s2048_s28 + $0x48] sm:$0xff] }
  0x1d   : > { %v1788_v17 = vround.rtne.f32 %v205_v6  ;;  %v209_v18 = vmul.f32 255.0, %v177_v13  ;;  %v1786_v19 = vround.rtne.f32 %v203_v10  ;;  %v208_v22 = vmul.f32 255.0, %v176_v14  ;;  %v178_v32 = vld [vmem:[%s2048_s28 + $0x40] sm:$0xff]  ;;  %v181_v33 = vld [vmem:[%s2048_s28 + $0x58] sm:$0xff]  ;;  %v180_v34 = vld [vmem:[%s2048_s28 + $0x50] sm:$0xff] }
  0x1e   : > { %v1790_v20 = vround.rtne.f32 %v207_v11  ;;  %v1789_v21 = vround.rtne.f32 %v206_v12  ;;  %v268_v23 = vmax.f32 %v1787_v15, 0.0  ;;  %v266_v24 = vmax.f32 %v1785_v16, 0.0  ;;  %v183_v39 = vld [vmem:[%s2048_s28 + $0x68] sm:$0xff]  ;;  %v182_v40 = vld [vmem:[%s2048_s28 + $0x60] sm:$0xff]  ;;  %v185_v45 = vld [vmem:[%s2048_s28 + $0x78] sm:$0xff] }
  0x1f   : > { %v269_v25 = vmax.f32 %v1788_v17, 0.0  ;;  %v1792_v26 = vround.rtne.f32 %v209_v18  ;;  %v267_v28 = vmax.f32 %v1786_v19, 0.0  ;;  %v1791_v31 = vround.rtne.f32 %v208_v22  ;;  %v184_v50 = vld [vmem:[%s2048_s28 + $0x70] sm:$0xff]  ;;  %v187_v3 = vld [vmem:[%s2048_s28 + $0x88] sm:$0xff]  ;;  %v186_v8 = vld [vmem:[%s2048_s28 + $0x80] sm:$0xff] }
  0x20   : > { %v271_v29 = vmax.f32 %v1790_v20, 0.0  ;;  %v270_v30 = vmax.f32 %v1789_v21, 0.0  ;;  %v2062_v35 = vmin.f32 %v268_v23, 255.0  ;;  %v2064_v36 = vmin.f32 %v266_v24, 255.0  ;;  %v189_v9 = vld [vmem:[%s2048_s28 + $0x98] sm:$0xff]  ;;  %v188_v10 = vld [vmem:[%s2048_s28 + $0x90] sm:$0xff] }
  0x21   : > { %v2066_v37 = vmin.f32 %v269_v25, 255.0  ;;  %v273_v38 = vmax.f32 %v1792_v26, 0.0  ;;  %v2070_v41 = vmin.f32 %v267_v28, 255.0  ;;  %v272_v44 = vmax.f32 %v1791_v31, 0.0  ;;  %v191_v15 = vld [vmem:[%s2048_s28 + $0xa8] sm:$0xff]  ;;  %v190_v16 = vld [vmem:[%s2048_s28 + $0xa0] sm:$0xff] }
  0x22   : > { %v2072_v42 = vmin.f32 %v271_v29, 255.0  ;;  %v2074_v43 = vmin.f32 %v270_v30, 255.0  ;;  %421 = vrot.lane.b32.xlu1 %v2062_v35, %s1935_s29  ;;  %417 = vrot.lane.b32.xlu0 %v2064_v36, %s1935_s29  ;;  %v211_v47 = vmul.f32 255.0, %v179_v27  ;;  %v210_v48 = vmul.f32 255.0, %v178_v32  ;;  %363 = vst.msk [vmem:[#allocation2 + $0x10] sm:$0xff] %vm359_vm1, %v2062_v35  ;;  %360 = vst.msk [vmem:[#allocation2] sm:$0xff] %vm359_vm1, %v2064_v36 }
  0x23   : > { %v2081_v46 = vmin.f32 %v273_v38, 255.0  ;;  %v213_v49 = vmul.f32 255.0, %v181_v33  ;;  %364 = vst.msk [vmem:[#allocation2 + $0x18] sm:$0x3f] %vm361_vm2, %v2066_v37  ;;  %v2090_v51 = vmin.f32 %v272_v44, 255.0  ;;  %v212_v52 = vmul.f32 255.0, %v180_v34 }
  0x24   : > { %v215_v53 = vmul.f32 255.0, %v183_v39  ;;  %v214_v54 = vmul.f32 255.0, %v182_v40  ;;  %365 = vst.msk [vmem:[#allocation2 + $0x20] sm:$0xff] %vm359_vm1, %v2074_v43  ;;  %v1794_v55 = vround.rtne.f32 %v211_v47  ;;  %v1793_v56 = vround.rtne.f32 %v210_v48  ;;  %v193_v21 = vld [vmem:[%s2048_s28 + $0xb8] sm:$0xff]  ;;  %v192_v26 = vld [vmem:[%s2048_s28 + $0xb0] sm:$0xff] }
  0x25   : > { %362 = vst.msk [vmem:[#allocation2 + $0x8] sm:$0x3f] %vm361_vm2, %v2070_v41  ;;  %366 = vst.msk [vmem:[#allocation2 + $0x28] sm:$0x3f] %vm361_vm2, %v2072_v42  ;;  %v1796_v57 = vround.rtne.f32 %v213_v49  ;;  %v217_v58 = vmul.f32 255.0, %v185_v45  ;;  %v1795_v59 = vround.rtne.f32 %v212_v52  ;;  %v216_v62 = vmul.f32 255.0, %v184_v50 }
  0x26   : > { %368 = vst.msk [vmem:[#allocation2 + $0x38] sm:$0x3f] %vm361_vm2, %v2081_v46  ;;  %v1798_v60 = vround.rtne.f32 %v215_v53  ;;  %v1797_v61 = vround.rtne.f32 %v214_v54  ;;  %423 = vrot.lane.b32.xlu1 %v2066_v37, %s1935_s29  ;;  %419 = vrot.lane.b32.xlu0 %v2070_v41, %s1935_s29  ;;  %v275_v63 = vmax.f32 %v1794_v55, 0.0  ;;  %v274_v0 = vmax.f32 %v1793_v56, 0.0  ;;  %v195_v55 = vld [vmem:[%s2048_s28 + $0xc8] sm:$0xff]  ;;  %v194_v56 = vld [vmem:[%s2048_s28 + $0xc0] sm:$0xff] }
  0x27   : > { %367 = vst.msk [vmem:[#allocation2 + $0x30] sm:$0xff] %vm359_vm1, %v2090_v51  ;;  %v277_v1 = vmax.f32 %v1796_v57, 0.0  ;;  %v1800_v2 = vround.rtne.f32 %v217_v58  ;;  %v276_v4 = vmax.f32 %v1795_v59, 0.0  ;;  %v1799_v7 = vround.rtne.f32 %v216_v62  ;;  %v197_v57 = vld [vmem:[%s2048_s28 + $0xd8] sm:$0xff]  ;;  %v196_v62 = vld [vmem:[%s2048_s28 + $0xd0] sm:$0xff] }
  0x28   : > { %v279_v5 = vmax.f32 %v1798_v60, 0.0  ;;  %v278_v6 = vmax.f32 %v1797_v61, 0.0  ;;  %v2110_v11 = vmin.f32 %v275_v63, 255.0  ;;  %v2112_v12 = vmin.f32 %v274_v0, 255.0 }
  0x29   : > { %v2114_v13 = vmin.f32 %v277_v1, 255.0  ;;  %v281_v14 = vmax.f32 %v1800_v2, 0.0  ;;  %v2118_v17 = vmin.f32 %v276_v4, 255.0  ;;  %v280_v20 = vmax.f32 %v1799_v7, 0.0 }
  0x2a   : > { %v2120_v18 = vmin.f32 %v279_v5, 255.0  ;;  %v2122_v19 = vmin.f32 %v278_v6, 255.0  ;;  %427 = vrot.lane.b32.xlu1 %v2072_v42, %s1935_s29  ;;  %425 = vrot.lane.b32.xlu0 %v2074_v43, %s1935_s29  ;;  %v219_v23 = vmul.f32 255.0, %v187_v3  ;;  %v218_v24 = vmul.f32 255.0, %v186_v8  ;;  %369 = vst.msk [vmem:[#allocation2 + $0x40] sm:$0xff] %vm359_vm1, %v2112_v12 }
  0x2b   : > { %v2129_v22 = vmin.f32 %v281_v14, 255.0  ;;  %v221_v25 = vmul.f32 255.0, %v189_v9  ;;  %370 = vst.msk [vmem:[#allocation2 + $0x48] sm:$0x3f] %vm361_vm2, %v2110_v11  ;;  %372 = vst.msk [vmem:[#allocation2 + $0x58] sm:$0x3f] %vm361_vm2, %v2114_v13 }
  0x2c   : > { %v2138_v27 = vmin.f32 %v280_v20, 255.0  ;;  %v220_v28 = vmul.f32 255.0, %v188_v10  ;;  %v223_v29 = vmul.f32 255.0, %v191_v15  ;;  %v222_v30 = vmul.f32 255.0, %v190_v16  ;;  %371 = vst.msk [vmem:[#allocation2 + $0x50] sm:$0xff] %vm359_vm1, %v2118_v17  ;;  %373 = vst.msk [vmem:[#allocation2 + $0x60] sm:$0xff] %vm359_vm1, %v2122_v19 }
  0x2d   : > { %374 = vst.msk [vmem:[#allocation2 + $0x68] sm:$0x3f] %vm361_vm2, %v2120_v18  ;;  %v1802_v31 = vround.rtne.f32 %v219_v23  ;;  %v1801_v32 = vround.rtne.f32 %v218_v24  ;;  %v1804_v33 = vround.rtne.f32 %v221_v25  ;;  %v225_v34 = vmul.f32 255.0, %v193_v21  ;;  %376 = vst.msk [vmem:[#allocation2 + $0x78] sm:$0x3f] %vm361_vm2, %v2129_v22 }
  0x2e   : > { %v1803_v38 = vround.rtne.f32 %v220_v28  ;;  %v1806_v39 = vround.rtne.f32 %v223_v29  ;;  %v1805_v40 = vround.rtne.f32 %v222_v30  ;;  %v224_v44 = vmul.f32 255.0, %v192_v26  ;;  %375 = vst.msk [vmem:[#allocation2 + $0x70] sm:$0xff] %vm359_vm1, %v2138_v27  ;;  %431 = vrot.lane.b32.xlu1 %v2081_v46, %s1935_s29  ;;  %429 = vrot.lane.b32.xlu0 %v2090_v51, %s1935_s29 }
  0x2f   : > { %v283_v45 = vmax.f32 %v1802_v31, 0.0  ;;  %v282_v47 = vmax.f32 %v1801_v32, 0.0  ;;  %v285_v48 = vmax.f32 %v1804_v33, 0.0  ;;  %v1808_v49 = vround.rtne.f32 %v225_v34 }
  0x30   : > { %v284_v50 = vmax.f32 %v1803_v38, 0.0  ;;  %v287_v52 = vmax.f32 %v1806_v39, 0.0  ;;  %v286_v53 = vmax.f32 %v1805_v40, 0.0  ;;  %v1807_v54 = vround.rtne.f32 %v224_v44 }
  0x31   : > { %v2157_v58 = vmin.f32 %v283_v45, 255.0  ;;  %v2159_v59 = vmin.f32 %v282_v47, 255.0  ;;  %v2161_v60 = vmin.f32 %v285_v48, 255.0  ;;  %v289_v61 = vmax.f32 %v1808_v49, 0.0 }
  0x32   : > { %v2164_v63 = vmin.f32 %v284_v50, 255.0  ;;  %v2166_v0 = vmin.f32 %v287_v52, 255.0  ;;  %v2168_v1 = vmin.f32 %v286_v53, 255.0  ;;  %v288_v2 = vmax.f32 %v1807_v54, 0.0  ;;  %435 = vrot.lane.b32.xlu1 %v2110_v11, %s1935_s29  ;;  %433 = vrot.lane.b32.xlu0 %v2112_v12, %s1935_s29 }
  0x33   : > { %v2174_v3 = vmin.f32 %v289_v61, 255.0  ;;  %v227_v4 = vmul.f32 255.0, %v195_v55  ;;  %v226_v5 = vmul.f32 255.0, %v194_v56  ;;  %v229_v6 = vmul.f32 255.0, %v197_v57  ;;  %377 = vst.msk [vmem:[#allocation2 + $0x80] sm:$0xff] %vm359_vm1, %v2159_v59  ;;  %v1867_v55 = vld [vmem:[%s3007_s1] sm:$0xff]  }
  0x34   : > { %378 = vst.msk [vmem:[#allocation2 + $0x88] sm:$0x3f] %vm361_vm2, %v2157_v58  ;;  %380 = vst.msk [vmem:[#allocation2 + $0x98] sm:$0x3f] %vm361_vm2, %v2161_v60  ;;  %v2182_v7 = vmin.f32 %v288_v2, 255.0  ;;  %v228_v8 = vmul.f32 255.0, %v196_v62  ;;  %1742 = vmatprep.subr.bf16.mxu0 %v1867_v55  ;;  %1776 = vmatprep.subr.bf16.mxu1 %v1867_v55 }
  0x35   : > { %379 = vst.msk [vmem:[#allocation2 + $0x90] sm:$0xff] %vm359_vm1, %v2164_v63  ;;  %381 = vst.msk [vmem:[#allocation2 + $0xa0] sm:$0xff] %vm359_vm1, %v2168_v1  ;;  %v1810_v9 = vround.rtne.f32 %v227_v4  ;;  %v1809_v10 = vround.rtne.f32 %v226_v5  ;;  %v1812_v14 = vround.rtne.f32 %v229_v6  ;;  %1743 = vmatpush3.bf16.msra.mxu0 %v1867_v55  ;;  %1779 = vmatpush3.bf16.msra.mxu1 %v1867_v55  ;;  %v1868_v61 = vld [vmem:[%s3007_s1 + $0x8] sm:$0xff]   ;;  %v1869_v4 = vld [vmem:[%s3007_s1 + $0x10] ss:$0 sps:$4 sm:$0x33]  }
  0x36   : > { %382 = vst.msk [vmem:[#allocation2 + $0xa8] sm:$0x3f] %vm361_vm2, %v2166_v0  ;;  %384 = vst.msk [vmem:[#allocation2 + $0xb8] sm:$0x3f] %vm361_vm2, %v2174_v3  ;;  %v1811_v15 = vround.rtne.f32 %v228_v8  ;;  %439 = vrot.lane.b32.xlu1 %v2114_v13, %s1935_s29  ;;  %437 = vrot.lane.b32.xlu0 %v2118_v17, %s1935_s29  ;;  %v1446_v5 = vsel %vm1444_vm5, %v1869_v4, 0 }
  0x37   : > { %383 = vst.msk [vmem:[#allocation2 + $0xb0] sm:$0xff] %vm359_vm1, %v2182_v7  ;;  %v291_v16 = vmax.f32 %v1810_v9, 0.0  ;;  %v290_v20 = vmax.f32 %v1809_v10, 0.0  ;;  %v293_v21 = vmax.f32 %v1812_v14, 0.0  ;;  %1744 = vmatprep.subr.bf16.mxu0 %v1868_v61  ;;  %1777 = vmatprep.subr.bf16.mxu1 %v1868_v61 }
  0x38   : > { %v292_v23 = vmax.f32 %v1811_v15, 0.0 }
  0x39   : > { %v2198_v24 = vmin.f32 %v291_v16, 255.0  ;;  %v2200_v25 = vmin.f32 %v290_v20, 255.0  ;;  %v2202_v26 = vmin.f32 %v293_v21, 255.0  ;;  %1745 = vmatpush3.bf16.msra.mxu0 %v1868_v61  ;;  %1780 = vmatpush3.bf16.msra.mxu1 %v1868_v61 }
  0x3a   : > { %v2204_v28 = vmin.f32 %v292_v23, 255.0  ;;  %443 = vrot.lane.b32.xlu1 %v2120_v18, %s1935_s29  ;;  %441 = vrot.lane.b32.xlu0 %v2122_v19, %s1935_s29 }
  0x3b   : > { %385 = vst.msk [vmem:[#allocation2 + $0xc0] sm:$0xff] %vm359_vm1, %v2200_v25  ;;  %1782 = vmatprep.subr.msk.bf16.mxu0 %vm1444_vm5, %v1869_v4  ;;  %1783 = vmatprep.subr.msk.bf16.mxu1 %vm1444_vm5, %v1869_v4 }
  0x3c   : > { %386 = vst.msk [vmem:[#allocation2 + $0xc8] sm:$0x3f] %vm361_vm2, %v2198_v24  ;;  %388 = vst.msk [vmem:[#allocation2 + $0xd8] sm:$0x3f] %vm361_vm2, %v2202_v26  ;;  %vm1191_vm2 = vcmask 260320  }
  0x3d   : > { %387 = vst.msk [vmem:[#allocation2 + $0xd0] sm:$0xff] %vm359_vm1, %v2204_v28  ;;  %1747 = vmatpush3.bf16.msra.mxu0 %v1446_v5  ;;  %1781 = vmatpush3.bf16.msra.mxu1 %v1446_v5  ;;  %vm1189_vm1 = vcmask 261345  }
  0x3e   : > { %447 = vrot.lane.b32.xlu1 %v2129_v22, %s1935_s29  ;;  %445 = vrot.lane.b32.xlu0 %v2138_v27, %s1935_s29 }
  0x42   : > { %451 = vrot.lane.b32.xlu1 %v2157_v58, %s1935_s29  ;;  %449 = vrot.lane.b32.xlu0 %v2159_v59, %s1935_s29 }
  0x46   : > { %455 = vrot.lane.b32.xlu1 %v2161_v60, %s1935_s29  ;;  %453 = vrot.lane.b32.xlu0 %v2164_v63, %s1935_s29 }
  0x4a   : > { %459 = vrot.lane.b32.xlu1 %v2166_v0, %s1935_s29  ;;  %457 = vrot.lane.b32.xlu0 %v2168_v1, %s1935_s29 }
  0x4e   : > { %463 = vrot.lane.b32.xlu1 %v2174_v3, %s1935_s29  ;;  %461 = vrot.lane.b32.xlu0 %v2182_v7, %s1935_s29 }
  0x52   : > { %467 = vrot.lane.b32.xlu1 %v2198_v24, %s1935_s29  ;;  %465 = vrot.lane.b32.xlu0 %v2200_v25, %s1935_s29 }
  0x56   : > { %471 = vrot.lane.b32.xlu1 %v2202_v26, %s1935_s29  ;;  %469 = vrot.lane.b32.xlu0 %v2204_v28, %s1935_s29  ;;  %s2867_s29 = scalar_lea.vmem [#allocation3], %s1784_s26 }
  0x5a   : > { %533 = vrot.lane.b32.xlu1 %v2070_v41, %s1936_s30  ;;  %531 = vrot.lane.b32.xlu0 %v2064_v36, %s1936_s30 }
  0x5e   : > { %537 = vrot.lane.b32.xlu1 %v2066_v37, %s1936_s30  ;;  %535 = vrot.lane.b32.xlu0 %v2062_v35, %s1936_s30 }
  0x62   : > { %541 = vrot.lane.b32.xlu1 %v2072_v42, %s1936_s30  ;;  %539 = vrot.lane.b32.xlu0 %v2074_v43, %s1936_s30 }
  0x66   : > { %545 = vrot.lane.b32.xlu1 %v2081_v46, %s1936_s30  ;;  %543 = vrot.lane.b32.xlu0 %v2090_v51, %s1936_s30 }
  0x6a   : > { %549 = vrot.lane.b32.xlu1 %v2110_v11, %s1936_s30  ;;  %547 = vrot.lane.b32.xlu0 %v2112_v12, %s1936_s30 }
  0x6e   : > { %553 = vrot.lane.b32.xlu1 %v2114_v13, %s1936_s30  ;;  %551 = vrot.lane.b32.xlu0 %v2118_v17, %s1936_s30 }
  0x72   : > { %557 = vrot.lane.b32.xlu1 %v2120_v18, %s1936_s30  ;;  %555 = vrot.lane.b32.xlu0 %v2122_v19, %s1936_s30 }
  0x76   : > { %561 = vrot.lane.b32.xlu1 %v2129_v22, %s1936_s30  ;;  %559 = vrot.lane.b32.xlu0 %v2138_v27, %s1936_s30 }
  0x7a   : > { %565 = vrot.lane.b32.xlu1 %v2157_v58, %s1936_s30  ;;  %563 = vrot.lane.b32.xlu0 %v2159_v59, %s1936_s30 }
  0x7e   : > { %569 = vrot.lane.b32.xlu1 %v2161_v60, %s1936_s30  ;;  %567 = vrot.lane.b32.xlu0 %v2164_v63, %s1936_s30 }
  0x82   : > { %573 = vrot.lane.b32.xlu1 %v2166_v0, %s1936_s30  ;;  %571 = vrot.lane.b32.xlu0 %v2168_v1, %s1936_s30 }
  0x86   : > { %577 = vrot.lane.b32.xlu1 %v2174_v3, %s1936_s30  ;;  %575 = vrot.lane.b32.xlu0 %v2182_v7, %s1936_s30 }
  0x8a   : > { %581 = vrot.lane.b32.xlu1 %v2198_v24, %s1936_s30  ;;  %579 = vrot.lane.b32.xlu0 %v2200_v25, %s1936_s30 }
  0x8e   : > { %585 = vrot.lane.b32.xlu1 %v2202_v26, %s1936_s30  ;;  %583 = vrot.lane.b32.xlu0 %v2204_v28, %s1936_s30 }
  0x92   : > { %649 = vrot.lane.b32.xlu1 %v2066_v37, %s1937_s4  ;;  %647 = vrot.lane.b32.xlu0 %v2062_v35, %s1937_s4 }
  0x94   : > { %v422_v36 = vpop.permute.xlu1 %421  ;;  %v418_v41 = vpop.permute.xlu0 %417 }
  0x95   : > { %505 = vst.msk [vmem:[#allocation2 + $0xf] sm:$0xfe] %vm501_vm3, %v422_v36  ;;  %502 = vst.msk [vmem:[#allocation2 - $0x1] sm:$0xfe] %vm501_vm3, %v418_v41 }
  0x96   : > { %653 = vrot.lane.b32.xlu1 %v2072_v42, %s1937_s4  ;;  %651 = vrot.lane.b32.xlu0 %v2074_v43, %s1937_s4 }
  0x98   : > { %v424_v29 = vpop.permute.xlu1 %423  ;;  %v420_v30 = vpop.permute.xlu0 %419 }
  0x99   : > { %506 = vst.msk [vmem:[#allocation2 + $0x17] sm:$0x7f] %vm503_vm4, %v424_v29  ;;  %504 = vst.msk [vmem:[#allocation2 + $0x7] sm:$0x7f] %vm503_vm4, %v420_v30 }
  0x9a   : > { %657 = vrot.lane.b32.xlu1 %v2081_v46, %s1937_s4  ;;  %655 = vrot.lane.b32.xlu0 %v2090_v51, %s1937_s4 }
  0x9c   : > { %v428_v31 = vpop.permute.xlu1 %427  ;;  %v426_v32 = vpop.permute.xlu0 %425 }
  0x9d   : > { %508 = vst.msk [vmem:[#allocation2 + $0x27] sm:$0x7f] %vm503_vm4, %v428_v31 }
  0x9e   : > { %507 = vst.msk [vmem:[#allocation2 + $0x1f] sm:$0xfe] %vm501_vm3, %v426_v32  ;;  %661 = vrot.lane.b32.xlu1 %v2110_v11, %s1937_s4  ;;  %659 = vrot.lane.b32.xlu0 %v2112_v12, %s1937_s4 }
  0xa0   : > { %v432_v33 = vpop.permute.xlu1 %431  ;;  %v430_v34 = vpop.permute.xlu0 %429 }
  0xa1   : > { %510 = vst.msk [vmem:[#allocation2 + $0x37] sm:$0x7f] %vm503_vm4, %v432_v33 }
  0xa2   : > { %509 = vst.msk [vmem:[#allocation2 + $0x2f] sm:$0xfe] %vm501_vm3, %v430_v34  ;;  %665 = vrot.lane.b32.xlu1 %v2114_v13, %s1937_s4  ;;  %663 = vrot.lane.b32.xlu0 %v2118_v17, %s1937_s4 }
  0xa4   : > { %v436_v38 = vpop.permute.xlu1 %435  ;;  %v434_v39 = vpop.permute.xlu0 %433 }
  0xa5   : > { %512 = vst.msk [vmem:[#allocation2 + $0x47] sm:$0x7f] %vm503_vm4, %v436_v38 }
  0xa6   : > { %511 = vst.msk [vmem:[#allocation2 + $0x3f] sm:$0xfe] %vm501_vm3, %v434_v39  ;;  %761 = vrot.lane.b32.xlu1 %v2062_v35, %s1938_s5  ;;  %667 = vrot.lane.b32.xlu0 %v2122_v19, %s1937_s4 }
  0xa8   : > { %v440_v40 = vpop.permute.xlu1 %439  ;;  %v438_v44 = vpop.permute.xlu0 %437 }
  0xa9   : > { %514 = vst.msk [vmem:[#allocation2 + $0x57] sm:$0x7f] %vm503_vm4, %v440_v40 }
  0xaa   : > { %513 = vst.msk [vmem:[#allocation2 + $0x4f] sm:$0xfe] %vm501_vm3, %v438_v44  ;;  %765 = vrot.lane.b32.xlu1 %v2074_v43, %s1938_s5  ;;  %763 = vrot.lane.b32.xlu0 %v2066_v37, %s1938_s5 }
  0xac   : > { %v444_v45 = vpop.permute.xlu1 %443  ;;  %v442_v47 = vpop.permute.xlu0 %441 }
  0xad   : > { %516 = vst.msk [vmem:[#allocation2 + $0x67] sm:$0x7f] %vm503_vm4, %v444_v45 }
  0xae   : > { %515 = vst.msk [vmem:[#allocation2 + $0x5f] sm:$0xfe] %vm501_vm3, %v442_v47  ;;  %875 = vrot.lane.b32.xlu1 %v2062_v35, %s1939_s6  ;;  %767 = vrot.lane.b32.xlu0 %v2072_v42, %s1938_s5 }
  0xb0   : > { %v448_v48 = vpop.permute.xlu1 %447  ;;  %v446_v49 = vpop.permute.xlu0 %445 }
  0xb1   : > { %518 = vst.msk [vmem:[#allocation2 + $0x77] sm:$0x7f] %vm503_vm4, %v448_v48 }
  0xb2   : > { %517 = vst.msk [vmem:[#allocation2 + $0x6f] sm:$0xfe] %vm501_vm3, %v446_v49  ;;  %879 = vrot.lane.b32.xlu1 %v2074_v43, %s1939_s6  ;;  %877 = vrot.lane.b32.xlu0 %v2066_v37, %s1939_s6 }
  0xb4   : > { %v452_v50 = vpop.permute.xlu1 %451  ;;  %v450_v52 = vpop.permute.xlu0 %449 }
  0xb5   : > { %520 = vst.msk [vmem:[#allocation2 + $0x87] sm:$0x7f] %vm503_vm4, %v452_v50 }
  0xb6   : > { %519 = vst.msk [vmem:[#allocation2 + $0x7f] sm:$0xfe] %vm501_vm3, %v450_v52  ;;  %991 = vrot.lane.b32.xlu1 %v2074_v43, %s1940_s7  ;;  %881 = vrot.lane.b32.xlu0 %v2072_v42, %s1939_s6 }
  0xb8   : > { %v456_v35 = vpop.permute.xlu1 %455  ;;  %v454_v53 = vpop.permute.xlu0 %453 }
  0xb9   : > { %522 = vst.msk [vmem:[#allocation2 + $0x97] sm:$0x7f] %vm503_vm4, %v456_v35 }
  0xba   : > { %521 = vst.msk [vmem:[#allocation2 + $0x8f] sm:$0xfe] %vm501_vm3, %v454_v53  ;;  %995 = vrot.lane.b32.xlu1 %v2090_v51, %s1940_s7  ;;  %993 = vrot.lane.b32.xlu0 %v2072_v42, %s1940_s7 }
  0xbc   : > { %v460_v37 = vpop.permute.xlu1 %459  ;;  %v458_v54 = vpop.permute.xlu0 %457 }
  0xbd   : > { %524 = vst.msk [vmem:[#allocation2 + $0xa7] sm:$0x7f] %vm503_vm4, %v460_v37 }
  0xbe   : > { %523 = vst.msk [vmem:[#allocation2 + $0x9f] sm:$0xfe] %vm501_vm3, %v458_v54  ;;  %1105 = vrot.lane.b32.xlu1 %v2074_v43, %s1941_s10  ;;  %997 = vrot.lane.b32.xlu0 %v2081_v46, %s1940_s7 }
  0xc0   : > { %v464_v56 = vpop.permute.xlu1 %463  ;;  %v462_v57 = vpop.permute.xlu0 %461 }
  0xc1   : > { %526 = vst.msk [vmem:[#allocation2 + $0xb7] sm:$0x7f] %vm503_vm4, %v464_v56 }
  0xc2   : > { %525 = vst.msk [vmem:[#allocation2 + $0xaf] sm:$0xfe] %vm501_vm3, %v462_v57  ;;  %1109 = vrot.lane.b32.xlu1 %v2090_v51, %s1941_s10  ;;  %1107 = vrot.lane.b32.xlu0 %v2072_v42, %s1941_s10 }
  0xc4   : > { %v468_v62 = vpop.permute.xlu1 %467  ;;  %v466_v2 = vpop.permute.xlu0 %465 }
  0xc5   : > { %528 = vst.msk [vmem:[#allocation2 + $0xc7] sm:$0x7f] %vm503_vm4, %v468_v62 }
  0xc6   : > { %527 = vst.msk [vmem:[#allocation2 + $0xbf] sm:$0xfe] %vm501_vm3, %v466_v2  ;;  %1219 = vrot.lane.b32.xlu1 %v2074_v43, %s1942_s24  ;;  %1111 = vrot.lane.b32.xlu0 %v2081_v46, %s1941_s10 }
  0xc8   : > { %v472_v6 = vpop.permute.xlu1 %471  ;;  %v470_v8 = vpop.permute.xlu0 %469 }
  0xc9   : > { %530 = vst.msk [vmem:[#allocation2 + $0xd7] sm:$0x7f] %vm503_vm4, %v472_v6  ;;  %vm1305_vm4 = vcmask 294144  }
  0xca   : > { %529 = vst.msk [vmem:[#allocation2 + $0xcf] sm:$0xfe] %vm501_vm3, %v470_v8  ;;  %1223 = vrot.lane.b32.xlu1 %v2090_v51, %s1942_s24  ;;  %1221 = vrot.lane.b32.xlu0 %v2072_v42, %s1942_s24  ;;  %vm1303_vm3 = vcmask 294146  }
  0xcc   : > { %v534_v43 = vpop.permute.xlu1 %533  ;;  %v532_v9 = vpop.permute.xlu0 %531 }
  0xcd   : > { %618 = vst.msk [vmem:[#allocation2 + $0x6] sm:$0xff] %vm617_vm6, %v534_v43 }
  0xce   : > { %616 = vst.msk [vmem:[#allocation2 - $0x2] sm:$0xfc] %vm615_vm7, %v532_v9  ;;  %679 = vrot.lane.b32.xlu1 %v2164_v63, %s1937_s4  ;;  %1225 = vrot.lane.b32.xlu0 %v2081_v46, %s1942_s24 }
  0xd0   : > { %v538_v10 = vpop.permute.xlu1 %537  ;;  %v536_v14 = vpop.permute.xlu0 %535 }
  0xd1   : > { %620 = vst.msk [vmem:[#allocation2 + $0x16] sm:$0xff] %vm617_vm6, %v538_v10 }
  0xd2   : > { %619 = vst.msk [vmem:[#allocation2 + $0xe] sm:$0xfc] %vm615_vm7, %v536_v14  ;;  %683 = vrot.lane.b32.xlu1 %v2168_v1, %s1937_s4  ;;  %681 = vrot.lane.b32.xlu0 %v2161_v60, %s1937_s4 }
  0xd4   : > { %v542_v42 = vpop.permute.xlu1 %541  ;;  %v540_v15 = vpop.permute.xlu0 %539 }
  0xd5   : > { %622 = vst.msk [vmem:[#allocation2 + $0x26] sm:$0xff] %vm617_vm6, %v542_v42 }
  0xd6   : > { %621 = vst.msk [vmem:[#allocation2 + $0x1e] sm:$0xfc] %vm615_vm7, %v540_v15  ;;  %769 = vrot.lane.b32.xlu1 %v2090_v51, %s1938_s5  ;;  %685 = vrot.lane.b32.xlu0 %v2166_v0, %s1937_s4 }
  0xd8   : > { %v546_v16 = vpop.permute.xlu1 %545  ;;  %v544_v20 = vpop.permute.xlu0 %543 }
  0xd9   : > { %624 = vst.msk [vmem:[#allocation2 + $0x36] sm:$0xff] %vm617_vm6, %v546_v16 }
  0xda   : > { %623 = vst.msk [vmem:[#allocation2 + $0x2e] sm:$0xfc] %vm615_vm7, %v544_v20  ;;  %793 = vrot.lane.b32.xlu1 %v2164_v63, %s1938_s5  ;;  %771 = vrot.lane.b32.xlu0 %v2081_v46, %s1938_s5 }
  0xdc   : > { %v550_v21 = vpop.permute.xlu1 %549  ;;  %v548_v23 = vpop.permute.xlu0 %547 }
  0xdd   : > { %626 = vst.msk [vmem:[#allocation2 + $0x46] sm:$0xff] %vm617_vm6, %v550_v21 }
  0xde   : > { %625 = vst.msk [vmem:[#allocation2 + $0x3e] sm:$0xfc] %vm615_vm7, %v548_v23  ;;  %773 = vrot.lane.b32.xlu1 %v2112_v12, %s1938_s5  ;;  %795 = vrot.lane.b32.xlu0 %v2161_v60, %s1938_s5 }
  0xe0   : > { %v554_v36 = vpop.permute.xlu1 %553  ;;  %v552_v41 = vpop.permute.xlu0 %551 }
  0xe1   : > { %628 = vst.msk [vmem:[#allocation2 + $0x56] sm:$0xff] %vm617_vm6, %v554_v36 }
  0xe2   : > { %627 = vst.msk [vmem:[#allocation2 + $0x4e] sm:$0xfc] %vm615_vm7, %v552_v41  ;;  %797 = vrot.lane.b32.xlu1 %v2168_v1, %s1938_s5  ;;  %775 = vrot.lane.b32.xlu0 %v2110_v11, %s1938_s5 }
  0xe4   : > { %v558_v29 = vpop.permute.xlu1 %557  ;;  %v556_v30 = vpop.permute.xlu0 %555 }
  0xe5   : > { %630 = vst.msk [vmem:[#allocation2 + $0x66] sm:$0xff] %vm617_vm6, %v558_v29 }
  0xe6   : > { %629 = vst.msk [vmem:[#allocation2 + $0x5e] sm:$0xfc] %vm615_vm7, %v556_v30  ;;  %883 = vrot.lane.b32.xlu1 %v2090_v51, %s1939_s6  ;;  %799 = vrot.lane.b32.xlu0 %v2166_v0, %s1938_s5 }
  0xe8   : > { %v562_v31 = vpop.permute.xlu1 %561  ;;  %v560_v32 = vpop.permute.xlu0 %559 }
  0xe9   : > { %632 = vst.msk [vmem:[#allocation2 + $0x76] sm:$0xff] %vm617_vm6, %v562_v31 }
  0xea   : > { %631 = vst.msk [vmem:[#allocation2 + $0x6e] sm:$0xfc] %vm615_vm7, %v560_v32  ;;  %907 = vrot.lane.b32.xlu1 %v2164_v63, %s1939_s6  ;;  %885 = vrot.lane.b32.xlu0 %v2081_v46, %s1939_s6 }
  0xec   : > { %v566_v33 = vpop.permute.xlu1 %565  ;;  %v564_v34 = vpop.permute.xlu0 %563 }
  0xed   : > { %634 = vst.msk [vmem:[#allocation2 + $0x86] sm:$0xff] %vm617_vm6, %v566_v33 }
  0xee   : > { %633 = vst.msk [vmem:[#allocation2 + $0x7e] sm:$0xfc] %vm615_vm7, %v564_v34  ;;  %887 = vrot.lane.b32.xlu1 %v2112_v12, %s1939_s6  ;;  %909 = vrot.lane.b32.xlu0 %v2161_v60, %s1939_s6 }
  0xf0   : > { %v570_v51 = vpop.permute.xlu1 %569  ;;  %v568_v38 = vpop.permute.xlu0 %567 }
  0xf1   : > { %636 = vst.msk [vmem:[#allocation2 + $0x96] sm:$0xff] %vm617_vm6, %v570_v51 }
  0xf2   : > { %635 = vst.msk [vmem:[#allocation2 + $0x8e] sm:$0xfc] %vm615_vm7, %v568_v38  ;;  %911 = vrot.lane.b32.xlu1 %v2168_v1, %s1939_s6  ;;  %889 = vrot.lane.b32.xlu0 %v2110_v11, %s1939_s6 }
  0xf4   : > { %v574_v46 = vpop.permute.xlu1 %573  ;;  %v572_v39 = vpop.permute.xlu0 %571 }
  0xf5   : > { %638 = vst.msk [vmem:[#allocation2 + $0xa6] sm:$0xff] %vm617_vm6, %v574_v46 }
  0xf6   : > { %637 = vst.msk [vmem:[#allocation2 + $0x9e] sm:$0xfc] %vm615_vm7, %v572_v39  ;;  %999 = vrot.lane.b32.xlu1 %v2112_v12, %s1940_s7  ;;  %913 = vrot.lane.b32.xlu0 %v2166_v0, %s1939_s6 }
  0xf8   : > { %v578_v40 = vpop.permute.xlu1 %577  ;;  %v576_v44 = vpop.permute.xlu0 %575 }
  0xf9   : > { %640 = vst.msk [vmem:[#allocation2 + $0xb6] sm:$0xff] %vm617_vm6, %v578_v40 }
  0xfa   : > { %639 = vst.msk [vmem:[#allocation2 + $0xae] sm:$0xfc] %vm615_vm7, %v576_v44  ;;  %1023 = vrot.lane.b32.xlu1 %v2168_v1, %s1940_s7  ;;  %1001 = vrot.lane.b32.xlu0 %v2110_v11, %s1940_s7 }
  0xfc   : > { %v582_v45 = vpop.permute.xlu1 %581  ;;  %v580_v47 = vpop.permute.xlu0 %579 }
  0xfd   : > { %642 = vst.msk [vmem:[#allocation2 + $0xc6] sm:$0xff] %vm617_vm6, %v582_v45 }
  0xfe   : > { %641 = vst.msk [vmem:[#allocation2 + $0xbe] sm:$0xfc] %vm615_vm7, %v580_v47  ;;  %1003 = vrot.lane.b32.xlu1 %v2118_v17, %s1940_s7  ;;  %1025 = vrot.lane.b32.xlu0 %v2166_v0, %s1940_s7 }
 0x100   : > { %v586_v48 = vpop.permute.xlu1 %585  ;;  %v584_v49 = vpop.permute.xlu0 %583 }
 0x101   : > { %644 = vst.msk [vmem:[#allocation2 + $0xd6] sm:$0xff] %vm617_vm6, %v586_v48 }
 0x102   : > { %643 = vst.msk [vmem:[#allocation2 + $0xce] sm:$0xfc] %vm615_vm7, %v584_v49  ;;  %1027 = vrot.lane.b32.xlu1 %v2182_v7, %s1940_s7  ;;  %1005 = vrot.lane.b32.xlu0 %v2114_v13, %s1940_s7 }
 0x104   : > { %v650_v50 = vpop.permute.xlu1 %649  ;;  %v648_v52 = vpop.permute.xlu0 %647 }
 0x105   : > { %734 = vst.msk [vmem:[#allocation2 + $0x8] sm:$0x3f] %vm733_vm8, %v650_v50 }
 0x106   : > { %732 = vst.msk [vmem:[#allocation2] sm:$0xff] %vm731_vm9, %v648_v52  ;;  %1113 = vrot.lane.b32.xlu1 %v2112_v12, %s1941_s10  ;;  %1029 = vrot.lane.b32.xlu0 %v2174_v3, %s1940_s7 }
 0x108   : > { %v654_v35 = vpop.permute.xlu1 %653  ;;  %v652_v53 = vpop.permute.xlu0 %651 }
 0x109   : > { %736 = vst.msk [vmem:[#allocation2 + $0x18] sm:$0x3f] %vm733_vm8, %v654_v35 }
 0x10a   : > { %735 = vst.msk [vmem:[#allocation2 + $0x10] sm:$0xff] %vm731_vm9, %v652_v53  ;;  %1137 = vrot.lane.b32.xlu1 %v2168_v1, %s1941_s10  ;;  %1115 = vrot.lane.b32.xlu0 %v2110_v11, %s1941_s10 }
 0x10c   : > { %v658_v37 = vpop.permute.xlu1 %657  ;;  %v656_v54 = vpop.permute.xlu0 %655 }
 0x10d   : > { %738 = vst.msk [vmem:[#allocation2 + $0x28] sm:$0x3f] %vm733_vm8, %v658_v37 }
 0x10e   : > { %737 = vst.msk [vmem:[#allocation2 + $0x20] sm:$0xff] %vm731_vm9, %v656_v54  ;;  %1117 = vrot.lane.b32.xlu1 %v2118_v17, %s1941_s10  ;;  %1139 = vrot.lane.b32.xlu0 %v2166_v0, %s1941_s10 }
 0x110   : > { %v662_v55 = vpop.permute.xlu1 %661  ;;  %v660_v56 = vpop.permute.xlu0 %659 }
 0x111   : > { %740 = vst.msk [vmem:[#allocation2 + $0x38] sm:$0x3f] %vm733_vm8, %v662_v55 }
 0x112   : > { %739 = vst.msk [vmem:[#allocation2 + $0x30] sm:$0xff] %vm731_vm9, %v660_v56  ;;  %1141 = vrot.lane.b32.xlu1 %v2182_v7, %s1941_s10  ;;  %1119 = vrot.lane.b32.xlu0 %v2114_v13, %s1941_s10 }
 0x114   : > { %v666_v57 = vpop.permute.xlu1 %665  ;;  %v664_v61 = vpop.permute.xlu0 %663 }
 0x115   : > { %742 = vst.msk [vmem:[#allocation2 + $0x48] sm:$0x3f] %vm733_vm8, %v666_v57 }
 0x116   : > { %741 = vst.msk [vmem:[#allocation2 + $0x40] sm:$0xff] %vm731_vm9, %v664_v61  ;;  %1227 = vrot.lane.b32.xlu1 %v2112_v12, %s1942_s24  ;;  %1143 = vrot.lane.b32.xlu0 %v2174_v3, %s1941_s10 }
 0x118   : > { %v762_v62 = vpop.permute.xlu1 %761  ;;  %v668_v2 = vpop.permute.xlu0 %667 }
 0x119   : > { %846 = vst.msk [vmem:[#allocation2 - $0x1] sm:$0xfe] %vm845_vm10, %v762_v62 }
 0x11a   : > { %743 = vst.msk [vmem:[#allocation2 + $0x50] sm:$0xff] %vm731_vm9, %v668_v2  ;;  %1251 = vrot.lane.b32.xlu1 %v2168_v1, %s1942_s24  ;;  %1229 = vrot.lane.b32.xlu0 %v2110_v11, %s1942_s24 }
 0x11c   : > { %v766_v4 = vpop.permute.xlu1 %765  ;;  %v764_v5 = vpop.permute.xlu0 %763 }
 0x11d   : > { %849 = vst.msk [vmem:[#allocation2 + $0xf] sm:$0xfe] %vm845_vm10, %v766_v4 }
 0x11e   : > { %848 = vst.msk [vmem:[#allocation2 + $0x7] sm:$0x7f] %vm847_vm11, %v764_v5  ;;  %1231 = vrot.lane.b32.xlu1 %v2118_v17, %s1942_s24  ;;  %1253 = vrot.lane.b32.xlu0 %v2166_v0, %s1942_s24 }
 0x120   : > { %v876_v12 = vpop.permute.xlu1 %875  ;;  %v768_v6 = vpop.permute.xlu0 %767 }
 0x121   : > { %960 = vst.msk [vmem:[#allocation2 - $0x2] sm:$0xfc] %vm959_vm12, %v876_v12 }
 0x122   : > { %850 = vst.msk [vmem:[#allocation2 + $0x17] sm:$0x7f] %vm847_vm11, %v768_v6  ;;  %1255 = vrot.lane.b32.xlu1 %v2182_v7, %s1942_s24  ;;  %1233 = vrot.lane.b32.xlu0 %v2114_v13, %s1942_s24 }
 0x124   : > { %v880_v11 = vpop.permute.xlu1 %879  ;;  %v878_v1 = vpop.permute.xlu0 %877 }
 0x125   : > { %963 = vst.msk [vmem:[#allocation2 + $0xe] sm:$0xfc] %vm959_vm12, %v880_v11 }
 0x126   : > { %962 = vst.msk [vmem:[#allocation2 + $0x6] sm:$0xff] %vm961_vm13, %v878_v1  ;;  %687 = vrot.lane.b32.xlu1 %v2182_v7, %s1937_s4  ;;  %1257 = vrot.lane.b32.xlu0 %v2174_v3, %s1942_s24 }
 0x128   : > { %v992_v0 = vpop.permute.xlu1 %991  ;;  %v882_v8 = vpop.permute.xlu0 %881 }
 0x129   : > { %1076 = vst.msk [vmem:[#allocation2] sm:$0xff] %vm1075_vm14, %v992_v0 }
 0x12a   : > { %964 = vst.msk [vmem:[#allocation2 + $0x16] sm:$0xff] %vm961_vm13, %v882_v8  ;;  %669 = vrot.lane.b32.xlu1 %v2120_v18, %s1937_s4  ;;  %689 = vrot.lane.b32.xlu0 %v2174_v3, %s1937_s4 }
 0x12c   : > { %v996_v43 = vpop.permute.xlu1 %995  ;;  %v994_v9 = vpop.permute.xlu0 %993 }
 0x12d   : > { %1079 = vst.msk [vmem:[#allocation2 + $0x10] sm:$0xff] %vm1075_vm14, %v996_v43 }
 0x12e   : > { %1078 = vst.msk [vmem:[#allocation2 + $0x8] sm:$0x3f] %vm1077_vm15, %v994_v9  ;;  %693 = vrot.lane.b32.xlu1 %v2198_v24, %s1937_s4  ;;  %691 = vrot.lane.b32.xlu0 %v2200_v25, %s1937_s4 }
 0x130   : > { %v1106_v10 = vpop.permute.xlu1 %1105  ;;  %v998_v14 = vpop.permute.xlu0 %997 }
 0x131   : > { %1190 = vst.msk [vmem:[#allocation2 - $0x1] sm:$0xfe] %vm1189_vm1, %v1106_v10 }
 0x132   : > { %1080 = vst.msk [vmem:[#allocation2 + $0x18] sm:$0x3f] %vm1077_vm15, %v998_v14  ;;  %779 = vrot.lane.b32.xlu1 %v2114_v13, %s1938_s5  ;;  %777 = vrot.lane.b32.xlu0 %v2118_v17, %s1938_s5 }
 0x134   : > { %v1110_v42 = vpop.permute.xlu1 %1109  ;;  %v1108_v15 = vpop.permute.xlu0 %1107 }
 0x135   : > { %1193 = vst.msk [vmem:[#allocation2 + $0xf] sm:$0xfe] %vm1189_vm1, %v1110_v42 }
 0x136   : > { %1192 = vst.msk [vmem:[#allocation2 + $0x7] sm:$0x7f] %vm1191_vm2, %v1108_v15  ;;  %803 = vrot.lane.b32.xlu1 %v2174_v3, %s1938_s5  ;;  %801 = vrot.lane.b32.xlu0 %v2182_v7, %s1938_s5 }
 0x138   : > { %v1220_v16 = vpop.permute.xlu1 %1219  ;;  %v1112_v20 = vpop.permute.xlu0 %1111 }
 0x139   : > { %1304 = vst.msk [vmem:[#allocation2 - $0x2] sm:$0xfc] %vm1303_vm3, %v1220_v16 }
 0x13a   : > { %1194 = vst.msk [vmem:[#allocation2 + $0x17] sm:$0x7f] %vm1191_vm2, %v1112_v20  ;;  %783 = vrot.lane.b32.xlu1 %v2120_v18, %s1938_s5  ;;  %781 = vrot.lane.b32.xlu0 %v2122_v19, %s1938_s5 }
 0x13c   : > { %v1224_v21 = vpop.permute.xlu1 %1223  ;;  %v1222_v23 = vpop.permute.xlu0 %1221 }
 0x13d   : > { %1307 = vst.msk [vmem:[#allocation2 + $0xe] sm:$0xfc] %vm1303_vm3, %v1224_v21 }
 0x13e   : > { %1306 = vst.msk [vmem:[#allocation2 + $0x6] sm:$0xff] %vm1305_vm4, %v1222_v23  ;;  %807 = vrot.lane.b32.xlu1 %v2198_v24, %s1938_s5  ;;  %805 = vrot.lane.b32.xlu0 %v2200_v25, %s1938_s5 }
 0x140   : > { %v680_v36 = vpop.permute.xlu1 %679  ;;  %v1226_v41 = vpop.permute.xlu0 %1225 }
 0x141   : > { %749 = vst.msk [vmem:[#allocation2 + $0x80] sm:$0xff] %vm731_vm9, %v680_v36 }
 0x142   : > { %1308 = vst.msk [vmem:[#allocation2 + $0x16] sm:$0xff] %vm1305_vm4, %v1226_v41  ;;  %893 = vrot.lane.b32.xlu1 %v2114_v13, %s1939_s6  ;;  %891 = vrot.lane.b32.xlu0 %v2118_v17, %s1939_s6 }
 0x144   : > { %v684_v29 = vpop.permute.xlu1 %683  ;;  %v682_v30 = vpop.permute.xlu0 %681 }
 0x145   : > { %v1333_v31 = vld [vmem:[#allocation2] sm:$0xff]  ;;  %v1334_v32 = vld [vmem:[#allocation2 + $0x8] sm:$0xff]  ;;  %751 = vst.msk [vmem:[#allocation2 + $0x90] sm:$0xff] %vm731_vm9, %v684_v29 }
 0x146   : > { %750 = vst.msk [vmem:[#allocation2 + $0x88] sm:$0x3f] %vm733_vm8, %v682_v30  ;;  %v1361_v33 = vpack.c.bf16 %v1334_v32, %v1333_v31  ;;  %917 = vrot.lane.b32.xlu1 %v2174_v3, %s1939_s6  ;;  %915 = vrot.lane.b32.xlu0 %v2182_v7, %s1939_s6 }
 0x148   : > { %1748 = vmatprep.mubr.msk.bf16.mxu0 %vm330_vm0, %v1361_v33  ;;  %v770_v13 = vpop.permute.xlu1 %769  ;;  %v686_v34 = vpop.permute.xlu0 %685 }
 0x149   : > { %v1335_v17 = vld [vmem:[#allocation2 + $0x10] sm:$0xff]  ;;  %v1336_v51 = vld [vmem:[#allocation2 + $0x18] sm:$0xff]  ;;  %851 = vst.msk [vmem:[#allocation2 + $0x1f] sm:$0xfe] %vm845_vm10, %v770_v13 }
 0x14a   : > { %752 = vst.msk [vmem:[#allocation2 + $0x98] sm:$0x3f] %vm733_vm8, %v686_v34  ;;  %v1362_v38 = vpack.c.bf16 %v1336_v51, %v1335_v17  ;;  %897 = vrot.lane.b32.xlu1 %v2120_v18, %s1939_s6  ;;  %895 = vrot.lane.b32.xlu0 %v2122_v19, %s1939_s6 }
 0x14c   : > { %1749 = vmatmul.mubr.msk.bf16.vlgmr.msra.gmra.mrb[0].mxu0 %vm330_vm0, %v1362_v38  ;;  %v794_v3 = vpop.permute.xlu1 %793  ;;  %v772_v7 = vpop.permute.xlu0 %771 }
 0x14d   : > { %863 = vst.msk [vmem:[#allocation2 + $0x7f] sm:$0xfe] %vm845_vm10, %v794_v3 }
 0x14e   : > { %852 = vst.msk [vmem:[#allocation2 + $0x27] sm:$0x7f] %vm847_vm11, %v772_v7  ;;  %921 = vrot.lane.b32.xlu1 %v2198_v24, %s1939_s6  ;;  %919 = vrot.lane.b32.xlu0 %v2200_v25, %s1939_s6 }
 0x150   : > { %v774_v46 = vpop.permute.xlu1 %773  ;;  %v796_v39 = vpop.permute.xlu0 %795 }
 0x151   : > { %853 = vst.msk [vmem:[#allocation2 + $0x2f] sm:$0xfe] %vm845_vm10, %v774_v46 }
 0x152   : > { %864 = vst.msk [vmem:[#allocation2 + $0x87] sm:$0x7f] %vm847_vm11, %v796_v39  ;;  %1009 = vrot.lane.b32.xlu1 %v2120_v18, %s1940_s7  ;;  %1007 = vrot.lane.b32.xlu0 %v2122_v19, %s1940_s7 }
 0x154   : > { %v798_v40 = vpop.permute.xlu1 %797  ;;  %v776_v44 = vpop.permute.xlu0 %775 }
 0x155   : > { %865 = vst.msk [vmem:[#allocation2 + $0x8f] sm:$0xfe] %vm845_vm10, %v798_v40 }
 0x156   : > { %854 = vst.msk [vmem:[#allocation2 + $0x37] sm:$0x7f] %vm847_vm11, %v776_v44  ;;  %1033 = vrot.lane.b32.xlu1 %v2198_v24, %s1940_s7  ;;  %1031 = vrot.lane.b32.xlu0 %v2200_v25, %s1940_s7 }
 0x158   : > { %v884_v45 = vpop.permute.xlu1 %883  ;;  %v800_v47 = vpop.permute.xlu0 %799 }
 0x159   : > { %965 = vst.msk [vmem:[#allocation2 + $0x1e] sm:$0xfc] %vm959_vm12, %v884_v45 }
 0x15a   : > { %866 = vst.msk [vmem:[#allocation2 + $0x97] sm:$0x7f] %vm847_vm11, %v800_v47  ;;  %1013 = vrot.lane.b32.xlu1 %v2129_v22, %s1940_s7  ;;  %1011 = vrot.lane.b32.xlu0 %v2138_v27, %s1940_s7 }
 0x15c   : > { %v908_v48 = vpop.permute.xlu1 %907  ;;  %v886_v49 = vpop.permute.xlu0 %885 }
 0x15d   : > { %977 = vst.msk [vmem:[#allocation2 + $0x7e] sm:$0xfc] %vm959_vm12, %v908_v48 }
 0x15e   : > { %966 = vst.msk [vmem:[#allocation2 + $0x26] sm:$0xff] %vm961_vm13, %v886_v49  ;;  %1037 = vrot.lane.b32.xlu1 %v2202_v26, %s1940_s7  ;;  %1035 = vrot.lane.b32.xlu0 %v2204_v28, %s1940_s7 }
 0x160   : > { %v888_v50 = vpop.permute.xlu1 %887  ;;  %v910_v52 = vpop.permute.xlu0 %909 }
 0x161   : > { %967 = vst.msk [vmem:[#allocation2 + $0x2e] sm:$0xfc] %vm959_vm12, %v888_v50 }
 0x162   : > { %978 = vst.msk [vmem:[#allocation2 + $0x86] sm:$0xff] %vm961_vm13, %v910_v52  ;;  %1123 = vrot.lane.b32.xlu1 %v2120_v18, %s1941_s10  ;;  %1121 = vrot.lane.b32.xlu0 %v2122_v19, %s1941_s10 }
 0x164   : > { %v912_v35 = vpop.permute.xlu1 %911  ;;  %v890_v53 = vpop.permute.xlu0 %889 }
 0x165   : > { %979 = vst.msk [vmem:[#allocation2 + $0x8e] sm:$0xfc] %vm959_vm12, %v912_v35 }
 0x166   : > { %968 = vst.msk [vmem:[#allocation2 + $0x36] sm:$0xff] %vm961_vm13, %v890_v53  ;;  %1147 = vrot.lane.b32.xlu1 %v2198_v24, %s1941_s10  ;;  %1145 = vrot.lane.b32.xlu0 %v2200_v25, %s1941_s10  ;;  %v200_v53 = vld [vmem:[%s2048_s28 + $0xf0] sm:$0xff] }
 0x168   : > { %v1000_v37 = vpop.permute.xlu1 %999  ;;  %v914_v54 = vpop.permute.xlu0 %913 }
 0x169   : > { %1081 = vst.msk [vmem:[#allocation2 + $0x20] sm:$0xff] %vm1075_vm14, %v1000_v37 }
 0x16a   : > { %980 = vst.msk [vmem:[#allocation2 + $0x96] sm:$0xff] %vm961_vm13, %v914_v54  ;;  %1127 = vrot.lane.b32.xlu1 %v2129_v22, %s1941_s10  ;;  %1125 = vrot.lane.b32.xlu0 %v2138_v27, %s1941_s10 }
 0x16c   : > { %v1024_v55 = vpop.permute.xlu1 %1023  ;;  %v1002_v56 = vpop.permute.xlu0 %1001 }
 0x16d   : > { %1093 = vst.msk [vmem:[#allocation2 + $0x80] sm:$0xff] %vm1075_vm14, %v1024_v55 }
 0x16e   : > { %1082 = vst.msk [vmem:[#allocation2 + $0x28] sm:$0x3f] %vm1077_vm15, %v1002_v56  ;;  %1151 = vrot.lane.b32.xlu1 %v2202_v26, %s1941_s10  ;;  %1149 = vrot.lane.b32.xlu0 %v2204_v28, %s1941_s10 }
 0x170   : > { %v1004_v57 = vpop.permute.xlu1 %1003  ;;  %v1026_v61 = vpop.permute.xlu0 %1025 }
 0x171   : > { %1083 = vst.msk [vmem:[#allocation2 + $0x30] sm:$0xff] %vm1075_vm14, %v1004_v57 }
 0x172   : > { %1094 = vst.msk [vmem:[#allocation2 + $0x88] sm:$0x3f] %vm1077_vm15, %v1026_v61  ;;  %1237 = vrot.lane.b32.xlu1 %v2120_v18, %s1942_s24  ;;  %1235 = vrot.lane.b32.xlu0 %v2122_v19, %s1942_s24  ;;  %v199_v18 = vld [vmem:[%s2048_s28 + $0xe8] sm:$0xff]  ;;  %v198_v19 = vld [vmem:[%s2048_s28 + $0xe0] sm:$0xff] }
 0x174   : > { %v1028_v62 = vpop.permute.xlu1 %1027  ;;  %v1006_v2 = vpop.permute.xlu0 %1005 }
 0x175   : > { %1095 = vst.msk [vmem:[#allocation2 + $0x90] sm:$0xff] %vm1075_vm14, %v1028_v62 }
 0x176   : > { %1084 = vst.msk [vmem:[#allocation2 + $0x38] sm:$0x3f] %vm1077_vm15, %v1006_v2  ;;  %1261 = vrot.lane.b32.xlu1 %v2198_v24, %s1942_s24  ;;  %1259 = vrot.lane.b32.xlu0 %v2200_v25, %s1942_s24  ;;  %v231_v24 = vmul.f32 255.0, %v199_v18  ;;  %v230_v25 = vmul.f32 255.0, %v198_v19 }
 0x178   : > { %v1114_v4 = vpop.permute.xlu1 %1113  ;;  %v1030_v5 = vpop.permute.xlu0 %1029  ;;  %v1814_v0 = vround.rtne.f32 %v231_v24  ;;  %v1813_v8 = vround.rtne.f32 %v230_v25 }
 0x179   : > { %1195 = vst.msk [vmem:[#allocation2 + $0x1f] sm:$0xfe] %vm1189_vm1, %v1114_v4 }
 0x17a   : > { %1096 = vst.msk [vmem:[#allocation2 + $0x98] sm:$0x3f] %vm1077_vm15, %v1030_v5  ;;  %1241 = vrot.lane.b32.xlu1 %v2129_v22, %s1942_s24  ;;  %1239 = vrot.lane.b32.xlu0 %v2138_v27, %s1942_s24  ;;  %v295_v10 = vmax.f32 %v1814_v0, 0.0  ;;  %v294_v14 = vmax.f32 %v1813_v8, 0.0 }
 0x17c   : > { %v1138_v12 = vpop.permute.xlu1 %1137  ;;  %v1116_v6 = vpop.permute.xlu0 %1115  ;;  %v2691_v16 = vmin.f32 %v295_v10, 255.0  ;;  %v2693_v20 = vmin.f32 %v294_v14, 255.0 }
 0x17d   : > { %1207 = vst.msk [vmem:[#allocation2 + $0x7f] sm:$0xfe] %vm1189_vm1, %v1138_v12 }
 0x17e   : > { %1196 = vst.msk [vmem:[#allocation2 + $0x27] sm:$0x7f] %vm1191_vm2, %v1116_v6  ;;  %1265 = vrot.lane.b32.xlu1 %v2202_v26, %s1942_s24  ;;  %1263 = vrot.lane.b32.xlu0 %v2204_v28, %s1942_s24 }
 0x180   : > { %v1118_v11 = vpop.permute.xlu1 %1117  ;;  %v1140_v1 = vpop.permute.xlu0 %1139 }
 0x181   : > { %1197 = vst.msk [vmem:[#allocation2 + $0x2f] sm:$0xfe] %vm1189_vm1, %v1118_v11 }
 0x182   : > { %1208 = vst.msk [vmem:[#allocation2 + $0x87] sm:$0x7f] %vm1191_vm2, %v1140_v1  ;;  %673 = vrot.lane.b32.xlu1 %v2129_v22, %s1937_s4  ;;  %671 = vrot.lane.b32.xlu0 %v2138_v27, %s1937_s4 }
 0x184   : > { %v1142_v43 = vpop.permute.xlu1 %1141  ;;  %v1120_v9 = vpop.permute.xlu0 %1119 }
 0x185   : > { %1209 = vst.msk [vmem:[#allocation2 + $0x8f] sm:$0xfe] %vm1189_vm1, %v1142_v43 }
 0x186   : > { %1198 = vst.msk [vmem:[#allocation2 + $0x37] sm:$0x7f] %vm1191_vm2, %v1120_v9  ;;  %697 = vrot.lane.b32.xlu1 %v2202_v26, %s1937_s4  ;;  %695 = vrot.lane.b32.xlu0 %v2204_v28, %s1937_s4 }
 0x188   : > { %v1228_v42 = vpop.permute.xlu1 %1227  ;;  %v1144_v15 = vpop.permute.xlu0 %1143 }
 0x189   : > { %1309 = vst.msk [vmem:[#allocation2 + $0x1e] sm:$0xfc] %vm1303_vm3, %v1228_v42 }
 0x18a   : > { %1210 = vst.msk [vmem:[#allocation2 + $0x97] sm:$0x7f] %vm1191_vm2, %v1144_v15  ;;  %677 = vrot.lane.b32.xlu1 %v2157_v58, %s1937_s4  ;;  %675 = vrot.lane.b32.xlu0 %v2159_v59, %s1937_s4 }
 0x18c   : > { %v1252_v21 = vpop.permute.xlu1 %1251  ;;  %v1230_v23 = vpop.permute.xlu0 %1229 }
 0x18d   : > { %1321 = vst.msk [vmem:[#allocation2 + $0x7e] sm:$0xfc] %vm1303_vm3, %v1252_v21 }
 0x18e   : > { %1310 = vst.msk [vmem:[#allocation2 + $0x26] sm:$0xff] %vm1305_vm4, %v1230_v23  ;;  %701 = vrot.lane.b32.xlu1 %v2691_v16, %s1937_s4  ;;  %699 = vrot.lane.b32.xlu0 %v2693_v20, %s1937_s4  ;;  %s1817_s4 = smul.u32 3584, %s1986_s16 }
 0x190   : > { %v1232_v36 = vpop.permute.xlu1 %1231  ;;  %v1254_v41 = vpop.permute.xlu0 %1253 }
 0x191   : > { %1311 = vst.msk [vmem:[#allocation2 + $0x2e] sm:$0xfc] %vm1303_vm3, %v1232_v36 }
 0x192   : > { %1322 = vst.msk [vmem:[#allocation2 + $0x86] sm:$0xff] %vm1305_vm4, %v1254_v41  ;;  %787 = vrot.lane.b32.xlu1 %v2129_v22, %s1938_s5  ;;  %785 = vrot.lane.b32.xlu0 %v2138_v27, %s1938_s5 }
 0x194   : > { %v1256_v29 = vpop.permute.xlu1 %1255  ;;  %v1234_v30 = vpop.permute.xlu0 %1233 }
 0x195   : > { %v1337_v31 = vld [vmem:[#allocation2 + $0x20] sm:$0xff]  ;;  %v1338_v32 = vld [vmem:[#allocation2 + $0x28] sm:$0xff]  ;;  %1323 = vst.msk [vmem:[#allocation2 + $0x8e] sm:$0xfc] %vm1303_vm3, %v1256_v29 }
 0x196   : > { %1312 = vst.msk [vmem:[#allocation2 + $0x36] sm:$0xff] %vm1305_vm4, %v1234_v30  ;;  %v1363_v33 = vpack.c.bf16 %v1338_v32, %v1337_v31  ;;  %811 = vrot.lane.b32.xlu1 %v2202_v26, %s1938_s5  ;;  %809 = vrot.lane.b32.xlu0 %v2204_v28, %s1938_s5 }
 0x198   : > { %1752 = vmatprep.mubr.msk.bf16.mxu0 %vm330_vm0, %v1363_v33  ;;  %v688_v13 = vpop.permute.xlu1 %687  ;;  %v1258_v34 = vpop.permute.xlu0 %1257 }
 0x199   : > { %v1349_v17 = vld [vmem:[#allocation2 + $0x80] sm:$0xff]  ;;  %v1350_v51 = vld [vmem:[#allocation2 + $0x88] sm:$0xff]  ;;  %753 = vst.msk [vmem:[#allocation2 + $0xa0] sm:$0xff] %vm731_vm9, %v688_v13 }
 0x19a   : > { %1324 = vst.msk [vmem:[#allocation2 + $0x96] sm:$0xff] %vm1305_vm4, %v1258_v34  ;;  %v1369_v38 = vpack.c.bf16 %v1350_v51, %v1349_v17  ;;  %791 = vrot.lane.b32.xlu1 %v2157_v58, %s1938_s5  ;;  %789 = vrot.lane.b32.xlu0 %v2159_v59, %s1938_s5 }
 0x19c   : > { %1764 = vmatprep.mubr.msk.bf16.mxu1 %vm330_vm0, %v1369_v38  ;;  %v670_v3 = vpop.permute.xlu1 %669  ;;  %v690_v7 = vpop.permute.xlu0 %689 }
 0x19d   : > { %v1339_v46 = vld [vmem:[#allocation2 + $0x30] sm:$0xff]  ;;  %v1340_v39 = vld [vmem:[#allocation2 + $0x38] sm:$0xff]  ;;  %744 = vst.msk [vmem:[#allocation2 + $0x58] sm:$0x3f] %vm733_vm8, %v670_v3  ;;  %754 = vst.msk [vmem:[#allocation2 + $0xa8] sm:$0x3f] %vm733_vm8, %v690_v7 }
 0x19e   : > { %v1364_v40 = vpack.c.bf16 %v1340_v39, %v1339_v46  ;;  %815 = vrot.lane.b32.xlu1 %v2691_v16, %s1938_s5  ;;  %813 = vrot.lane.b32.xlu0 %v2693_v20, %s1938_s5  ;;  %s1635_s5 = sshll.u32 %s2867_s29, 4  ;;  %s2958_s5 = int_to_ptr.vmem [resolvable:$true] %s1635_s5 }
 0x19f   : > { %s1870_s9 = scalar_lea.vmem %s2958_s5, 3584 }
 0x1a0   : > { %1753 = vmatmul.mubr.msk.bf16.gmra.mrb[4].mxu0 %vm330_vm0, %v1364_v40  ;;  %v694_v44 = vpop.permute.xlu1 %693  ;;  %v692_v45 = vpop.permute.xlu0 %691  ;;  %p1871_p11 = scmp.ne.s32.totalorder %s2958_s5, %s1870_s9 }
 0x1a1   : > { %v1351_v47 = vld [vmem:[#allocation2 + $0x90] sm:$0xff]  ;;  %v1352_v48 = vld [vmem:[#allocation2 + $0x98] sm:$0xff]  ;;  %756 = vst.msk [vmem:[#allocation2 + $0xb8] sm:$0x3f] %vm733_vm8, %v694_v44 }
 0x1a2   : > { %755 = vst.msk [vmem:[#allocation2 + $0xb0] sm:$0xff] %vm731_vm9, %v692_v45  ;;  %v1370_v49 = vpack.c.bf16 %v1352_v48, %v1351_v47  ;;  %901 = vrot.lane.b32.xlu1 %v2129_v22, %s1939_s6  ;;  %899 = vrot.lane.b32.xlu0 %v2138_v27, %s1939_s6  ;;  %v201_v27 = vld [vmem:[%s2048_s28 + $0xf8] sm:$0xff]  ;;  %p1872_p12 = pnand %p1871_p11, %p2003_p5 }
 0x1a4   : > { %1765 = vmatmul.mubr.msk.bf16.vlgmr.msra.gmra.mrb[0].mxu1 %vm330_vm0, %v1370_v49  ;;  %v780_v50 = vpop.permute.xlu1 %779  ;;  %v778_v52 = vpop.permute.xlu0 %777  ;;  %p1873_p13 = pneg %p1872_p12 }
 0x1a5   : > { %856 = vst.msk [vmem:[#allocation2 + $0x47] sm:$0x7f] %vm847_vm11, %v780_v50 }
 0x1a6   : > { %855 = vst.msk [vmem:[#allocation2 + $0x3f] sm:$0xfe] %vm845_vm10, %v778_v52  ;;  %925 = vrot.lane.b32.xlu1 %v2202_v26, %s1939_s6  ;;  %923 = vrot.lane.b32.xlu0 %v2204_v28, %s1939_s6  ;;  %v233_v26 = vmul.f32 255.0, %v201_v27  ;;  %v232_v28 = vmul.f32 255.0, %v200_v53 }
 0x1a8   : > { %v804_v35 = vpop.permute.xlu1 %803  ;;  %v802_v22 = vpop.permute.xlu0 %801  ;;  %v1816_v57 = vround.rtne.f32 %v233_v26  ;;  %v1815_v61 = vround.rtne.f32 %v232_v28 }
 0x1a9   : > { %868 = vst.msk [vmem:[#allocation2 + $0xa7] sm:$0x7f] %vm847_vm11, %v804_v35 }
 0x1aa   : > { %867 = vst.msk [vmem:[#allocation2 + $0x9f] sm:$0xfe] %vm845_vm10, %v802_v22  ;;  %905 = vrot.lane.b32.xlu1 %v2157_v58, %s1939_s6  ;;  %903 = vrot.lane.b32.xlu0 %v2159_v59, %s1939_s6  ;;  %v297_v4 = vmax.f32 %v1816_v57, 0.0  ;;  %v296_v5 = vmax.f32 %v1815_v61, 0.0 }
 0x1ac   : > { %v784_v37 = vpop.permute.xlu1 %783  ;;  %v782_v54 = vpop.permute.xlu0 %781  ;;  %v329_v12 = vmin.f32 %v297_v4, 255.0  ;;  %v328_v6 = vmin.f32 %v296_v5, 255.0 }
 0x1ad   : > { %858 = vst.msk [vmem:[#allocation2 + $0x57] sm:$0x7f] %vm847_vm11, %v784_v37 }
 0x1ae   : > { %857 = vst.msk [vmem:[#allocation2 + $0x4f] sm:$0xfe] %vm845_vm10, %v782_v54  ;;  %929 = vrot.lane.b32.xlu1 %v2691_v16, %s1939_s6  ;;  %927 = vrot.lane.b32.xlu0 %v2693_v20, %s1939_s6 }
 0x1b0   : > { %v808_v55 = vpop.permute.xlu1 %807  ;;  %v806_v56 = vpop.permute.xlu0 %805 }
 0x1b1   : > { %870 = vst.msk [vmem:[#allocation2 + $0xb7] sm:$0x7f] %vm847_vm11, %v808_v55 }
 0x1b2   : > { %869 = vst.msk [vmem:[#allocation2 + $0xaf] sm:$0xfe] %vm845_vm10, %v806_v56  ;;  %1017 = vrot.lane.b32.xlu1 %v2157_v58, %s1940_s7  ;;  %1015 = vrot.lane.b32.xlu0 %v2159_v59, %s1940_s7 }
 0x1b4   : > { %v894_v62 = vpop.permute.xlu1 %893  ;;  %v892_v2 = vpop.permute.xlu0 %891 }
 0x1b5   : > { %970 = vst.msk [vmem:[#allocation2 + $0x46] sm:$0xff] %vm961_vm13, %v894_v62 }
 0x1b6   : > { %969 = vst.msk [vmem:[#allocation2 + $0x3e] sm:$0xfc] %vm959_vm12, %v892_v2  ;;  %1041 = vrot.lane.b32.xlu1 %v2691_v16, %s1940_s7  ;;  %1039 = vrot.lane.b32.xlu0 %v2693_v20, %s1940_s7 }
 0x1b8   : > { %v918_v18 = vpop.permute.xlu1 %917  ;;  %v916_v19 = vpop.permute.xlu0 %915 }
 0x1b9   : > { %982 = vst.msk [vmem:[#allocation2 + $0xa6] sm:$0xff] %vm961_vm13, %v918_v18 }
 0x1ba   : > { %981 = vst.msk [vmem:[#allocation2 + $0x9e] sm:$0xfc] %vm959_vm12, %v916_v19  ;;  %1021 = vrot.lane.b32.xlu1 %v2161_v60, %s1940_s7  ;;  %1019 = vrot.lane.b32.xlu0 %v2164_v63, %s1940_s7 }
 0x1bc   : > { %v898_v24 = vpop.permute.xlu1 %897  ;;  %v896_v25 = vpop.permute.xlu0 %895 }
 0x1bd   : > { %972 = vst.msk [vmem:[#allocation2 + $0x56] sm:$0xff] %vm961_vm13, %v898_v24 }
 0x1be   : > { %971 = vst.msk [vmem:[#allocation2 + $0x4e] sm:$0xfc] %vm959_vm12, %v896_v25  ;;  %1045 = vrot.lane.b32.xlu1 %v329_v12, %s1940_s7  ;;  %1043 = vrot.lane.b32.xlu0 %v328_v6, %s1940_s7  ;;  %s2956_s7 = scalar_lea.hbm %s3009_s3, %s1817_s4 }
 0x1c0   : > { %v922_v11 = vpop.permute.xlu1 %921  ;;  %v920_v1 = vpop.permute.xlu0 %919 }
 0x1c1   : > { %984 = vst.msk [vmem:[#allocation2 + $0xb6] sm:$0xff] %vm961_vm13, %v922_v11 }
 0x1c2   : > { %983 = vst.msk [vmem:[#allocation2 + $0xae] sm:$0xfc] %vm959_vm12, %v920_v1  ;;  %1131 = vrot.lane.b32.xlu1 %v2157_v58, %s1941_s10  ;;  %1129 = vrot.lane.b32.xlu0 %v2159_v59, %s1941_s10 }
 0x1c4   : > { %v1010_v0 = vpop.permute.xlu1 %1009  ;;  %v1008_v8 = vpop.permute.xlu0 %1007 }
 0x1c5   : > { %1086 = vst.msk [vmem:[#allocation2 + $0x48] sm:$0x3f] %vm1077_vm15, %v1010_v0 }
 0x1c6   : > { %1085 = vst.msk [vmem:[#allocation2 + $0x40] sm:$0xff] %vm1075_vm14, %v1008_v8  ;;  %1155 = vrot.lane.b32.xlu1 %v2691_v16, %s1941_s10  ;;  %1153 = vrot.lane.b32.xlu0 %v2693_v20, %s1941_s10 }
 0x1c8   : > { %v1034_v43 = vpop.permute.xlu1 %1033  ;;  %v1032_v9 = vpop.permute.xlu0 %1031 }
 0x1c9   : > { %1098 = vst.msk [vmem:[#allocation2 + $0xa8] sm:$0x3f] %vm1077_vm15, %v1034_v43 }
 0x1ca   : > { %1097 = vst.msk [vmem:[#allocation2 + $0xa0] sm:$0xff] %vm1075_vm14, %v1032_v9  ;;  %1135 = vrot.lane.b32.xlu1 %v2161_v60, %s1941_s10  ;;  %1133 = vrot.lane.b32.xlu0 %v2164_v63, %s1941_s10 }
 0x1cc   : > { %v1014_v10 = vpop.permute.xlu1 %1013  ;;  %v1012_v14 = vpop.permute.xlu0 %1011 }
 0x1cd   : > { %1088 = vst.msk [vmem:[#allocation2 + $0x58] sm:$0x3f] %vm1077_vm15, %v1014_v10 }
 0x1ce   : > { %1087 = vst.msk [vmem:[#allocation2 + $0x50] sm:$0xff] %vm1075_vm14, %v1012_v14  ;;  %1159 = vrot.lane.b32.xlu1 %v329_v12, %s1941_s10  ;;  %1157 = vrot.lane.b32.xlu0 %v328_v6, %s1941_s10  ;;  %s1943_s10 = smov [#allocation3]  }
 0x1cf   : > { %s1874_s11 = sshll.u32 %s1943_s10, 4  ;;  %s1875_s11 = int_to_ptr.vmem [resolvable:$false] %s1874_s11 }
 0x1d0   : > { %v1038_v42 = vpop.permute.xlu1 %1037  ;;  %v1036_v15 = vpop.permute.xlu0 %1035  ;;  %s1876_s17 = scalar_lea.vmem %s1875_s11, 7168  ;;  %p1877_p0 = scmp.lt.s32.totalorder %s2958_s5, %s1875_s11 }
 0x1d1   : > { %1100 = vst.msk [vmem:[#allocation2 + $0xb8] sm:$0x3f] %vm1077_vm15, %v1038_v42  ;;  %p1878_p1 = scmp.lt.s32.totalorder %s1876_s17, %s1870_s9 }
 0x1d2   : > { %1099 = vst.msk [vmem:[#allocation2 + $0xb0] sm:$0xff] %vm1075_vm14, %v1036_v15  ;;  %1245 = vrot.lane.b32.xlu1 %v2157_v58, %s1942_s24  ;;  %1243 = vrot.lane.b32.xlu0 %v2159_v59, %s1942_s24 }
 0x1d3   : > { %p1879_p2 = por %p1878_p1, %p1877_p0 }
 0x1d4   : > { %v1124_v21 = vpop.permute.xlu1 %1123  ;;  %v1122_v23 = vpop.permute.xlu0 %1121 }
 0x1d5   : > { %1200 = vst.msk [vmem:[#allocation2 + $0x47] sm:$0x7f] %vm1191_vm2, %v1124_v21  ;;  %p1880_p3 = pnand %p1879_p2, %p1873_p13 }
 0x1d6   : > { %1199 = vst.msk [vmem:[#allocation2 + $0x3f] sm:$0xfe] %vm1189_vm1, %v1122_v23  ;;  %1269 = vrot.lane.b32.xlu1 %v2691_v16, %s1942_s24  ;;  %1267 = vrot.lane.b32.xlu0 %v2693_v20, %s1942_s24 }
 0x1d8   : > { %v1148_v36 = vpop.permute.xlu1 %1147  ;;  %v1146_v41 = vpop.permute.xlu0 %1145 }
 0x1d9   : > { %1212 = vst.msk [vmem:[#allocation2 + $0xa7] sm:$0x7f] %vm1191_vm2, %v1148_v36 }
 0x1da   : > { %1211 = vst.msk [vmem:[#allocation2 + $0x9f] sm:$0xfe] %vm1189_vm1, %v1146_v41  ;;  %1249 = vrot.lane.b32.xlu1 %v2161_v60, %s1942_s24  ;;  %1247 = vrot.lane.b32.xlu0 %v2164_v63, %s1942_s24 }
 0x1dc   : > { %v1128_v58 = vpop.permute.xlu1 %1127  ;;  %v1126_v59 = vpop.permute.xlu0 %1125 }
 0x1dd   : > { %1202 = vst.msk [vmem:[#allocation2 + $0x57] sm:$0x7f] %vm1191_vm2, %v1128_v58 }
 0x1de   : > { %1201 = vst.msk [vmem:[#allocation2 + $0x4f] sm:$0xfe] %vm1189_vm1, %v1126_v59  ;;  %1273 = vrot.lane.b32.xlu1 %v329_v12, %s1942_s24  ;;  %1271 = vrot.lane.b32.xlu0 %v328_v6, %s1942_s24  ;;  %v2861_v12 = vld [vmem:[%s3008_s2] ss:$0 sm:$0xff] }
 0x1e0   : > { %v1152_v16 = vpop.permute.xlu1 %1151  ;;  %v1150_v20 = vpop.permute.xlu0 %1149 }
 0x1e1   : > { %1214 = vst.msk [vmem:[#allocation2 + $0xb7] sm:$0x7f] %vm1191_vm2, %v1152_v16 }
 0x1e2   : > { %1213 = vst.msk [vmem:[#allocation2 + $0xaf] sm:$0xfe] %vm1189_vm1, %v1150_v20 }
 0x1e4   : > { %v1238_v60 = vpop.permute.xlu1 %1237  ;;  %v1236_v29 = vpop.permute.xlu0 %1235 }
 0x1e5   : > { %1314 = vst.msk [vmem:[#allocation2 + $0x46] sm:$0xff] %vm1305_vm4, %v1238_v60 }
 0x1e6   : > { %1313 = vst.msk [vmem:[#allocation2 + $0x3e] sm:$0xfc] %vm1303_vm3, %v1236_v29 }
 0x1e8   : > { %v1262_v63 = vpop.permute.xlu1 %1261  ;;  %v1260_v30 = vpop.permute.xlu0 %1259 }
 0x1e9   : > { %1326 = vst.msk [vmem:[#allocation2 + $0xa6] sm:$0xff] %vm1305_vm4, %v1262_v63 }
 0x1ea   : > { %1325 = vst.msk [vmem:[#allocation2 + $0x9e] sm:$0xfc] %vm1303_vm3, %v1260_v30 }
 0x1ec   : > { %v1242_v31 = vpop.permute.xlu1 %1241  ;;  %v1240_v32 = vpop.permute.xlu0 %1239  ;;  %v1342_v13 = vld [vmem:[#allocation2 + $0x48] sm:$0xff] }
 0x1ed   : > { %v1341_v33 = vld [vmem:[#allocation2 + $0x40] sm:$0xff]  ;;  %1316 = vst.msk [vmem:[#allocation2 + $0x56] sm:$0xff] %vm1305_vm4, %v1242_v31 }
 0x1ee   : > { %1315 = vst.msk [vmem:[#allocation2 + $0x4e] sm:$0xfc] %vm1303_vm3, %v1240_v32  ;;  %v1365_v34 = vpack.c.bf16 %v1342_v13, %v1341_v33 }
 0x1f0   : > { %1756 = vmatprep.mubr.msk.bf16.mxu0 %vm330_vm0, %v1365_v34  ;;  %v1266_v17 = vpop.permute.xlu1 %1265  ;;  %v1264_v51 = vpop.permute.xlu0 %1263  ;;  %v1354_v3 = vld [vmem:[#allocation2 + $0xa8] sm:$0xff] }
 0x1f1   : > { %v1353_v38 = vld [vmem:[#allocation2 + $0xa0] sm:$0xff]  ;;  %1328 = vst.msk [vmem:[#allocation2 + $0xb6] sm:$0xff] %vm1305_vm4, %v1266_v17 }
 0x1f2   : > { %1327 = vst.msk [vmem:[#allocation2 + $0xae] sm:$0xfc] %vm1303_vm3, %v1264_v51  ;;  %v1371_v7 = vpack.c.bf16 %v1354_v3, %v1353_v38 }
 0x1f4   : > { %1768 = vmatprep.mubr.msk.bf16.mxu1 %vm330_vm0, %v1371_v7  ;;  %v674_v46 = vpop.permute.xlu1 %673  ;;  %v672_v39 = vpop.permute.xlu0 %671  ;;  %v1344_v44 = vld [vmem:[#allocation2 + $0x58] sm:$0xff] }
 0x1f5   : > { %v1343_v40 = vld [vmem:[#allocation2 + $0x50] sm:$0xff]  ;;  %746 = vst.msk [vmem:[#allocation2 + $0x68] sm:$0x3f] %vm733_vm8, %v674_v46 }
 0x1f6   : > { %745 = vst.msk [vmem:[#allocation2 + $0x60] sm:$0xff] %vm731_vm9, %v672_v39  ;;  %v1366_v45 = vpack.c.bf16 %v1344_v44, %v1343_v40 }
 0x1f8   : > { %1757 = vmatmul.mubr.msk.bf16.gmra.mrb[8].mxu0 %vm330_vm0, %v1366_v45  ;;  %v698_v47 = vpop.permute.xlu1 %697  ;;  %v696_v48 = vpop.permute.xlu0 %695  ;;  %v1356_v50 = vld [vmem:[#allocation2 + $0xb8] sm:$0xff] }
 0x1f9   : > { %v1355_v49 = vld [vmem:[#allocation2 + $0xb0] sm:$0xff]  ;;  %758 = vst.msk [vmem:[#allocation2 + $0xc8] sm:$0x3f] %vm733_vm8, %v698_v47 }
 0x1fa   : > { %757 = vst.msk [vmem:[#allocation2 + $0xc0] sm:$0xff] %vm731_vm9, %v696_v48  ;;  %v1372_v52 = vpack.c.bf16 %v1356_v50, %v1355_v49 }
 0x1fc   : > { %1769 = vmatmul.mubr.msk.bf16.gmra.mrb[4].mxu1 %vm330_vm0, %v1372_v52  ;;  %v678_v35 = vpop.permute.xlu1 %677  ;;  %v676_v22 = vpop.permute.xlu0 %675 }
 0x1fd   : > { %748 = vst.msk [vmem:[#allocation2 + $0x78] sm:$0x3f] %vm733_vm8, %v678_v35 }
 0x1fe   : > { %747 = vst.msk [vmem:[#allocation2 + $0x70] sm:$0xff] %vm731_vm9, %v676_v22 }
 0x200   : > { %v702_v27 = vpop.permute.xlu1 %701  ;;  %v700_v53 = vpop.permute.xlu0 %699 }
 0x201   : > { %760 = vst.msk [vmem:[#allocation2 + $0xd8] sm:$0x3f] %vm733_vm8, %v702_v27 }
 0x202   : > { %759 = vst.msk [vmem:[#allocation2 + $0xd0] sm:$0xff] %vm731_vm9, %v700_v53 }
 0x204   : > { %v788_v37 = vpop.permute.xlu1 %787  ;;  %v786_v54 = vpop.permute.xlu0 %785 }
 0x205   : > { %860 = vst.msk [vmem:[#allocation2 + $0x67] sm:$0x7f] %vm847_vm11, %v788_v37 }
 0x206   : > { %859 = vst.msk [vmem:[#allocation2 + $0x5f] sm:$0xfe] %vm845_vm10, %v786_v54 }
 0x208   : > { %v812_v26 = vpop.permute.xlu1 %811  ;;  %v810_v28 = vpop.permute.xlu0 %809 }
 0x209   : > { %872 = vst.msk [vmem:[#allocation2 + $0xc7] sm:$0x7f] %vm847_vm11, %v812_v26 }
 0x20a   : > { %871 = vst.msk [vmem:[#allocation2 + $0xbf] sm:$0xfe] %vm845_vm10, %v810_v28 }
 0x20c   : > { %v792_v55 = vpop.permute.xlu1 %791  ;;  %v790_v56 = vpop.permute.xlu0 %789 }
 0x20d   : > { %862 = vst.msk [vmem:[#allocation2 + $0x77] sm:$0x7f] %vm847_vm11, %v792_v55 }
 0x20e   : > { %861 = vst.msk [vmem:[#allocation2 + $0x6f] sm:$0xfe] %vm845_vm10, %v790_v56 }
 0x210   : > { %v816_v57 = vpop.permute.xlu1 %815  ;;  %v814_v61 = vpop.permute.xlu0 %813 }
 0x211   : > { %874 = vst.msk [vmem:[#allocation2 + $0xd7] sm:$0x7f] %vm847_vm11, %v816_v57 }
 0x212   : > { %873 = vst.msk [vmem:[#allocation2 + $0xcf] sm:$0xfe] %vm845_vm10, %v814_v61 }
 0x214   : > { %v902_v62 = vpop.permute.xlu1 %901  ;;  %v900_v2 = vpop.permute.xlu0 %899 }
 0x215   : > { %974 = vst.msk [vmem:[#allocation2 + $0x66] sm:$0xff] %vm961_vm13, %v902_v62 }
 0x216   : > { %973 = vst.msk [vmem:[#allocation2 + $0x5e] sm:$0xfc] %vm959_vm12, %v900_v2 }
 0x218   : > { %v926_v4 = vpop.permute.xlu1 %925  ;;  %v924_v5 = vpop.permute.xlu0 %923 }
 0x219   : > { %986 = vst.msk [vmem:[#allocation2 + $0xc6] sm:$0xff] %vm961_vm13, %v926_v4 }
 0x21a   : > { %985 = vst.msk [vmem:[#allocation2 + $0xbe] sm:$0xfc] %vm959_vm12, %v924_v5 }
 0x21c   : > { %v906_v18 = vpop.permute.xlu1 %905  ;;  %v904_v19 = vpop.permute.xlu0 %903 }
 0x21d   : > { %976 = vst.msk [vmem:[#allocation2 + $0x76] sm:$0xff] %vm961_vm13, %v906_v18 }
 0x21e   : > { %975 = vst.msk [vmem:[#allocation2 + $0x6e] sm:$0xfc] %vm959_vm12, %v904_v19 }
 0x21f   : > { %v1750_v6 = vpop.f32.mrb[0].mxu0 }
 0x220   : > { %v1491_v24 = vadd.f32 %v1750_v6, %v2861_v12  ;;  %v1482_v25 = vpop.f32.mrb[1].mxu0  ;;  %v930_v1 = vpop.permute.xlu1 %929 }
 0x221   : > { %v1483_v11 = vadd.f32 %v2861_v12, %v1482_v25  ;;  %v928_v0 = vpop.permute.xlu0 %927  ;;  %988 = vst.msk [vmem:[#allocation2 + $0xd6] sm:$0xff] %vm961_vm13, %v930_v1  ;;  %v1751_v8 = vpop.f32.mrb[2].mxu0 }
 0x222   : > { %1595 = vst [vmem:[%s2867_s29 + $0x10] sm:$0xff] %v1491_v24  ;;  %987 = vst.msk [vmem:[#allocation2 + $0xce] sm:$0xfc] %vm959_vm12, %v928_v0  ;;  %v1494_v43 = vadd.f32 %v1751_v8, %v2861_v12  ;;  %v1485_v9 = vpop.f32.mrb[3].mxu0 }
 0x223   : > { %1593 = vst [vmem:[%s2867_s29] sm:$0xff] %v1483_v11  ;;  %v1486_v10 = vadd.f32 %v2861_v12, %v1485_v9 }
 0x224   : > { %1596 = vst [vmem:[%s2867_s29 + $0x18] sm:$0xff] %v1494_v43  ;;  %v1018_v14 = vpop.permute.xlu1 %1017 }
 0x225   : > { %v1016_v42 = vpop.permute.xlu0 %1015  ;;  %1594 = vst [vmem:[%s2867_s29 + $0x8] sm:$0xff] %v1486_v10  ;;  %1090 = vst.msk [vmem:[#allocation2 + $0x68] sm:$0x3f] %vm1077_vm15, %v1018_v14 }
 0x226   : > { %1089 = vst.msk [vmem:[#allocation2 + $0x60] sm:$0xff] %vm1075_vm14, %v1016_v42 }
 0x228   : > { %v1042_v15 = vpop.permute.xlu1 %1041 }
 0x229   : > { %v1040_v21 = vpop.permute.xlu0 %1039  ;;  %1102 = vst.msk [vmem:[#allocation2 + $0xc8] sm:$0x3f] %vm1077_vm15, %v1042_v15 }
 0x22a   : > { %1101 = vst.msk [vmem:[#allocation2 + $0xc0] sm:$0xff] %vm1075_vm14, %v1040_v21 }
 0x22c   : > { %v1022_v23 = vpop.permute.xlu1 %1021 }
 0x22d   : > { %v1020_v36 = vpop.permute.xlu0 %1019  ;;  %1092 = vst.msk [vmem:[#allocation2 + $0x78] sm:$0x3f] %vm1077_vm15, %v1022_v23 }
 0x22e   : > { %1091 = vst.msk [vmem:[#allocation2 + $0x70] sm:$0xff] %vm1075_vm14, %v1020_v36 }
 0x230   : > { %v1046_v41 = vpop.permute.xlu1 %1045 }
 0x231   : > { %v1044_v58 = vpop.permute.xlu0 %1043  ;;  %1104 = vst.msk [vmem:[#allocation2 + $0xd8] sm:$0x3f] %vm1077_vm15, %v1046_v41 }
 0x232   : > { %1103 = vst.msk [vmem:[#allocation2 + $0xd0] sm:$0xff] %vm1075_vm14, %v1044_v58 }
 0x234   : > { %v1132_v59 = vpop.permute.xlu1 %1131 }
 0x235   : > { %v1130_v16 = vpop.permute.xlu0 %1129  ;;  %1204 = vst.msk [vmem:[#allocation2 + $0x67] sm:$0x7f] %vm1191_vm2, %v1132_v59 }
 0x236   : > { %1203 = vst.msk [vmem:[#allocation2 + $0x5f] sm:$0xfe] %vm1189_vm1, %v1130_v16 }
 0x238   : > { %v1156_v20 = vpop.permute.xlu1 %1155 }
 0x239   : > { %v1154_v60 = vpop.permute.xlu0 %1153  ;;  %1216 = vst.msk [vmem:[#allocation2 + $0xc7] sm:$0x7f] %vm1191_vm2, %v1156_v20 }
 0x23a   : > { %1215 = vst.msk [vmem:[#allocation2 + $0xbf] sm:$0xfe] %vm1189_vm1, %v1154_v60 }
 0x23c   : > { %v1136_v29 = vpop.permute.xlu1 %1135 }
 0x23d   : > { %v1134_v63 = vpop.permute.xlu0 %1133  ;;  %1206 = vst.msk [vmem:[#allocation2 + $0x77] sm:$0x7f] %vm1191_vm2, %v1136_v29 }
 0x23e   : > { %1205 = vst.msk [vmem:[#allocation2 + $0x6f] sm:$0xfe] %vm1189_vm1, %v1134_v63 }
 0x240   : > { %v1160_v30 = vpop.permute.xlu1 %1159 }
 0x241   : > { %v1158_v31 = vpop.permute.xlu0 %1157  ;;  %1218 = vst.msk [vmem:[#allocation2 + $0xd7] sm:$0x7f] %vm1191_vm2, %v1160_v30 }
 0x242   : > { %1217 = vst.msk [vmem:[#allocation2 + $0xcf] sm:$0xfe] %vm1189_vm1, %v1158_v31 }
 0x244   : > { %v1246_v32 = vpop.permute.xlu1 %1245 }
 0x245   : > { %v1244_v33 = vpop.permute.xlu0 %1243  ;;  %1318 = vst.msk [vmem:[#allocation2 + $0x66] sm:$0xff] %vm1305_vm4, %v1246_v32 }
 0x246   : > { %1317 = vst.msk [vmem:[#allocation2 + $0x5e] sm:$0xfc] %vm1303_vm3, %v1244_v33 }
 0x248   : > { %v1270_v13 = vpop.permute.xlu1 %1269 }
 0x249   : > { %v1268_v34 = vpop.permute.xlu0 %1267  ;;  %1330 = vst.msk [vmem:[#allocation2 + $0xc6] sm:$0xff] %vm1305_vm4, %v1270_v13 }
 0x24a   : > { %1329 = vst.msk [vmem:[#allocation2 + $0xbe] sm:$0xfc] %vm1303_vm3, %v1268_v34 }
 0x24c   : > { %v1250_v17 = vpop.permute.xlu1 %1249  ;;  %v1346_v3 = vld [vmem:[#allocation2 + $0x68] sm:$0xff] }
 0x24d   : > { %v1248_v51 = vpop.permute.xlu0 %1247  ;;  %v1345_v38 = vld [vmem:[#allocation2 + $0x60] sm:$0xff]  ;;  %1320 = vst.msk [vmem:[#allocation2 + $0x76] sm:$0xff] %vm1305_vm4, %v1250_v17 }
 0x24e   : > { %1319 = vst.msk [vmem:[#allocation2 + $0x6e] sm:$0xfc] %vm1303_vm3, %v1248_v51  ;;  %v1367_v7 = vpack.c.bf16 %v1346_v3, %v1345_v38 }
 0x250   : > { %1760 = vmatprep.mubr.msk.bf16.mxu0 %vm330_vm0, %v1367_v7  ;;  %v1274_v46 = vpop.permute.xlu1 %1273  ;;  %v1358_v44 = vld [vmem:[#allocation2 + $0xc8] sm:$0xff] }
 0x251   : > { %v1272_v39 = vpop.permute.xlu0 %1271  ;;  %v1357_v40 = vld [vmem:[#allocation2 + $0xc0] sm:$0xff]  ;;  %1332 = vst.msk [vmem:[#allocation2 + $0xd6] sm:$0xff] %vm1305_vm4, %v1274_v46 }
 0x252   : > { %1331 = vst.msk [vmem:[#allocation2 + $0xce] sm:$0xfc] %vm1303_vm3, %v1272_v39  ;;  %v1373_v45 = vpack.c.bf16 %v1358_v44, %v1357_v40 }
 0x254   : > { %1772 = vmatprep.mubr.msk.bf16.mxu1 %vm330_vm0, %v1373_v45  ;;  %v1348_v48 = vld [vmem:[#allocation2 + $0x78] sm:$0xff] }
 0x255   : > { %v1347_v47 = vld [vmem:[#allocation2 + $0x70] sm:$0xff] }
 0x256   : > { %v1368_v49 = vpack.c.bf16 %v1348_v48, %v1347_v47 }
 0x258   : > { %1761 = vmatmul.mubr.msk.bf16.gmra.mrb[12].mxu0 %vm330_vm0, %v1368_v49  ;;  %v1360_v52 = vld [vmem:[#allocation2 + $0xd8] sm:$0xff] }
 0x259   : > { %v1359_v50 = vld [vmem:[#allocation2 + $0xd0] sm:$0xff] }
 0x25a   : > { %v1374_v35 = vpack.c.bf16 %v1360_v52, %v1359_v50 }
 0x25c   : > { %1773 = vmatmul.mubr.msk.bf16.gmra.mrb[8].mxu1 %vm330_vm0, %v1374_v35 }
 0x273   : > { %v1754_v22 = vpop.f32.mrb[4].mxu0 }
 0x274   : > { %v1507_v27 = vadd.f32 %v1754_v22, %v2861_v12  ;;  %v1498_v53 = vpop.f32.mrb[5].mxu0 }
 0x275   : > { %v1499_v37 = vadd.f32 %v2861_v12, %v1498_v53  ;;  %v1755_v54 = vpop.f32.mrb[6].mxu0 }
 0x276   : > { %1599 = vst [vmem:[%s2867_s29 + $0x30] sm:$0xff] %v1507_v27  ;;  %v1510_v26 = vadd.f32 %v1755_v54, %v2861_v12  ;;  %v1501_v28 = vpop.f32.mrb[7].mxu0 }
 0x277   : > { %1597 = vst [vmem:[%s2867_s29 + $0x20] sm:$0xff] %v1499_v37  ;;  %v1502_v55 = vadd.f32 %v2861_v12, %v1501_v28  ;;  %v1766_v56 = vpop.f32.mrb[0].mxu1 }
 0x278   : > { %1600 = vst [vmem:[%s2867_s29 + $0x38] sm:$0xff] %v1510_v26  ;;  %v1555_v57 = vadd.f32 %v1766_v56, %v2861_v12  ;;  %v1546_v61 = vpop.f32.mrb[1].mxu1 }
 0x279   : > { %1598 = vst [vmem:[%s2867_s29 + $0x28] sm:$0xff] %v1502_v55  ;;  %v1547_v62 = vadd.f32 %v2861_v12, %v1546_v61  ;;  %v1767_v2 = vpop.f32.mrb[2].mxu1 }
 0x27a   : > { %1611 = vst [vmem:[%s2867_s29 + $0x90] sm:$0xff] %v1555_v57  ;;  %v1558_v4 = vadd.f32 %v1767_v2, %v2861_v12  ;;  %v1549_v5 = vpop.f32.mrb[3].mxu1 }
 0x27b   : > { %1609 = vst [vmem:[%s2867_s29 + $0x80] sm:$0xff] %v1547_v62  ;;  %v1550_v18 = vadd.f32 %v2861_v12, %v1549_v5 }
 0x27c   : > { %1612 = vst [vmem:[%s2867_s29 + $0x98] sm:$0xff] %v1558_v4 }
 0x27d   : > { %1610 = vst [vmem:[%s2867_s29 + $0x88] sm:$0xff] %v1550_v18 }
 0x2cb   : > { %v1758_v19 = vpop.f32.mrb[8].mxu0 }
 0x2cc   : > { %v1523_v6 = vadd.f32 %v1758_v19, %v2861_v12  ;;  %v1514_v24 = vpop.f32.mrb[9].mxu0 }
 0x2cd   : > { %v1515_v25 = vadd.f32 %v2861_v12, %v1514_v24  ;;  %v1759_v11 = vpop.f32.mrb[10].mxu0 }
 0x2ce   : > { %1603 = vst [vmem:[%s2867_s29 + $0x50] sm:$0xff] %v1523_v6  ;;  %v1526_v1 = vadd.f32 %v1759_v11, %v2861_v12  ;;  %v1517_v0 = vpop.f32.mrb[11].mxu0 }
 0x2cf   : > { %1601 = vst [vmem:[%s2867_s29 + $0x40] sm:$0xff] %v1515_v25  ;;  %v1518_v8 = vadd.f32 %v2861_v12, %v1517_v0  ;;  %v1770_v43 = vpop.f32.mrb[4].mxu1 }
 0x2d0   : > { %1604 = vst [vmem:[%s2867_s29 + $0x58] sm:$0xff] %v1526_v1  ;;  %v1571_v9 = vadd.f32 %v1770_v43, %v2861_v12  ;;  %v1562_v10 = vpop.f32.mrb[5].mxu1 }
 0x2d1   : > { %1602 = vst [vmem:[%s2867_s29 + $0x48] sm:$0xff] %v1518_v8  ;;  %v1563_v14 = vadd.f32 %v2861_v12, %v1562_v10  ;;  %v1771_v42 = vpop.f32.mrb[6].mxu1 }
 0x2d2   : > { %1615 = vst [vmem:[%s2867_s29 + $0xb0] sm:$0xff] %v1571_v9  ;;  %v1574_v15 = vadd.f32 %v1771_v42, %v2861_v12  ;;  %v1565_v21 = vpop.f32.mrb[7].mxu1 }
 0x2d3   : > { %1613 = vst [vmem:[%s2867_s29 + $0xa0] sm:$0xff] %v1563_v14  ;;  %v1566_v23 = vadd.f32 %v2861_v12, %v1565_v21 }
 0x2d4   : > { %1616 = vst [vmem:[%s2867_s29 + $0xb8] sm:$0xff] %v1574_v15 }
 0x2d5   : > { %1614 = vst [vmem:[%s2867_s29 + $0xa8] sm:$0xff] %v1566_v23 }
 0x32b   : > { %v1762_v36 = vpop.f32.mrb[12].mxu0 }
 0x32c   : > { %v1539_v41 = vadd.f32 %v1762_v36, %v2861_v12  ;;  %v1530_v58 = vpop.f32.mrb[13].mxu0 }
 0x32d   : > { %v1531_v59 = vadd.f32 %v2861_v12, %v1530_v58  ;;  %v1763_v16 = vpop.f32.mrb[14].mxu0 }
 0x32e   : > { %1607 = vst [vmem:[%s2867_s29 + $0x70] sm:$0xff] %v1539_v41  ;;  %v1542_v20 = vadd.f32 %v1763_v16, %v2861_v12  ;;  %v1533_v60 = vpop.f32.mrb[15].mxu0 }
 0x32f   : > { %1605 = vst [vmem:[%s2867_s29 + $0x60] sm:$0xff] %v1531_v59  ;;  %v1534_v29 = vadd.f32 %v2861_v12, %v1533_v60  ;;  %v1774_v63 = vpop.f32.mrb[8].mxu1 }
 0x330   : > { %1608 = vst [vmem:[%s2867_s29 + $0x78] sm:$0xff] %v1542_v20  ;;  %v1587_v30 = vadd.f32 %v1774_v63, %v2861_v12  ;;  %v1578_v31 = vpop.f32.mrb[9].mxu1 }
 0x331   : > { %1606 = vst [vmem:[%s2867_s29 + $0x68] sm:$0xff] %v1534_v29  ;;  %v1579_v32 = vadd.f32 %v2861_v12, %v1578_v31  ;;  %v1775_v33 = vpop.f32.mrb[10].mxu1 }
 0x332   : > { %1619 = vst [vmem:[%s2867_s29 + $0xd0] sm:$0xff] %v1587_v30  ;;  %v1590_v13 = vadd.f32 %v1775_v33, %v2861_v12  ;;  %v1581_v34 = vpop.f32.mrb[11].mxu1 }
 0x333   : > { %1617 = vst [vmem:[%s2867_s29 + $0xc0] sm:$0xff] %v1579_v32  ;;  %v1582_v17 = vadd.f32 %v2861_v12, %v1581_v34 }
 0x334   : > { %1620 = vst [vmem:[%s2867_s29 + $0xd8] sm:$0xff] %v1590_v13 }
 0x335   : > { %1618 = vst [vmem:[%s2867_s29 + $0xc8] sm:$0xff] %v1582_v17 }
 0x336   : > { %1883 = shalt.err (!%p1880_p3)
}
 0x337   : > { %s1884_s19 = scalar_lea.hbm %s2956_s7, 3584  ;;  %s1888_s25 = scalar_lea.hbm %s3009_s3, 7168 }
 0x338   : > { %p1885_p4 = scmp.ne.s32.totalorder %s2956_s7, %s1884_s19  ;;  %p1889_p9 = scmp.lt.u32.totalorder %s2956_s7, %s3009_s3 }
 0x339   : > { %p1890_p10 = scmp.lt.u32.totalorder %s1888_s25, %s1884_s19  ;;  %p1892_p12 = scmp.lt.u32.totalorder %s1884_s19, %s2956_s7 }
 0x33a   : > { %p1886_p7 = pnand %p1885_p4, %p2003_p5 }
 0x33b   : > { %p1891_p11 = por %p1890_p10, %p1889_p9 }
 0x33c   : > { %p1887_p8 = pneg %p1886_p7 }
 0x33d   : > { %p1893_p13 = por %p1892_p12, %p1891_p11 }
 0x33f   : > { %p1894_p0 = pnand %p1893_p13, %p1887_p8 }
 0x341   : > { %1897 = shalt.err (!%p1894_p0)
}
 0x342   : > { %s1944_s28 = smov 128  }
 0x343   : > { %1818 = dma.vmem_to_hbm [thread:$0]  (%p2003_p5), %s2958_s5, 3584, %s2956_s7, %s2964_s8, %s1944_s28, %s1944_s28, %s1936_s30  }
 0x344 PF: > { %p1824_p1 = scmp.ge.s32.totalorder %s1932_s15, 2  ;;  %s1650_s29 = sand.u32 1, %s1920_s12  }
 0x345   : > { %s1651_s4 = scalar_lea.sflag [#allocation4], %s1650_s29 }
 0x346   : > { %p1821_p2 = pnand %p1824_p1, %p2007_p6 }
 0x348   : > { %1915 = dma.done.wait (!%p1821_p2), %s1651_s4, 3584  }
 0x349   : > { %1917 = vsyncadd (!%p1821_p2), %s1651_s4, 4294963712  ;;  %p13_p3 = scmp.ge.s32.totalorder %s1990_s18, 4   ;;  %s3012_s12 = smov %s1924_s13 }
 0x34a   : > { %s3013_s13 = smov %s1928_s14  ;;  %s3014_s14 = smov %s2001_s21 }
 0x34b   : > { %s3015_s15 = smov %s1990_s18  ;;  %15 = sbr.rel (!%p13_p3) target bundleno = 3 (0x3), region = 67 }
 0x352   :  { %1656 = vsyncpa [#allocation4], 1 }
 0x353   :  { %1658 = vsyncpa [#allocation4 + $0x1], 1 }

</bundles_post_ra>
